<compile_context>
chip_gen: v6e
topology: v6e:2x2x1
jax: 0.10.0
libtpu: 0.0.40
codegen_flags: <defaults>
</compile_context>

<pallas_src>
import functools

import jax
import jax.numpy as jnp
import numpy as np
from jax import lax
from jax.experimental import pallas as pl
from jax.experimental.pallas import tpu as pltpu


# ---------------------------------------------------------------------------
# kernel: one (batch, query-tile) step per grid point
# ---------------------------------------------------------------------------
def _attn_kernel(x_ref, w_in_ref, b_in_ref, w_out_ref, b_out_ref, out_ref,
                 k_s, v_s, *, seq_len, seq_pad, tq, chunk, bf16_softmax):
    C = x_ref.shape[-1]
    scale = C ** -0.5                       # n_heads = 1 -> d_head = C
    qi = pl.program_id(1)

    # --- per-batch K / V projection into persistent VMEM scratch ------------
    # Only at the first query tile of each batch element.  Correct because grid
    # axis 1 is "arbitrary" (sequential), so the scratch persists for later tiles.
    # Chunked so fp32 transients stay bounded at real VAE sizes.
    @pl.when(qi == 0)
    def _():
        for ci in range(seq_pad // chunk):                 # small static loop
            lo = ci * chunk
            xc = x_ref[0, lo:lo + chunk, :].astype(jnp.bfloat16)        # (chunk, C)
            k = jnp.dot(xc, w_in_ref[:, C:2 * C],
                        preferred_element_type=jnp.float32) + b_in_ref[:, C:2 * C]
            v = jnp.dot(xc, w_in_ref[:, 2 * C:],
                        preferred_element_type=jnp.float32) + b_in_ref[:, 2 * C:]
            # store K transposed: one XLU transpose per chunk per batch element
            k_s[:, lo:lo + chunk] = k.T.astype(jnp.bfloat16)            # (C, chunk)
            v_s[lo:lo + chunk, :] = v.astype(jnp.bfloat16)              # (chunk, C)

    # --- query tile sliced out of the already-resident full-sample block ----
    q_start = pl.multiple_of(qi * tq, tq)
    xq = x_ref[0, pl.ds(q_start, tq), :]                                # (tq, C) f32
    q = jnp.dot(xq.astype(jnp.bfloat16), w_in_ref[:, :C],
                preferred_element_type=jnp.float32) + b_in_ref[:, :C]
    q = (q * scale).astype(jnp.bfloat16)    # fold 1/sqrt(d_head) into Q (cheaper side)

    # --- scores + (un-normalized) softmax ------------------------------------
    s = jnp.dot(q, k_s[...], preferred_element_type=jnp.float32)       # (tq, S_pad)
    if seq_pad != seq_len:                  # static branch: mask padded key columns
        kmask = lax.broadcasted_iota(jnp.int32, (1, seq_pad), 1) < seq_len
        s = jnp.where(kmask, s, -1e30)
    m = jnp.max(s, axis=-1, keepdims=True)
    e = s - m
    if bf16_softmax:                        # bf16 exp: EUP-native on v6e/v7x
        e = e.astype(jnp.bfloat16)
    p = jnp.exp(e)
    l = jnp.sum(p, axis=-1, keepdims=True, dtype=jnp.float32)           # (tq, 1) f32

    # --- PV, deferred normalization ((tq, C) rescale instead of (tq, S)) ----
    ctx = jnp.dot(p.astype(jnp.bfloat16), v_s[...],
                  preferred_element_type=jnp.float32)                   # (tq, C)
    ctx = ctx * pl.reciprocal(l, approx=True)

    # --- output projection + residual ----------------------------------------
    out = jnp.dot(ctx.astype(jnp.bfloat16), w_out_ref[...],
                  preferred_element_type=jnp.float32) + b_out_ref[...]
    out_ref[0] = (out + xq).astype(out_ref.dtype)


# ---------------------------------------------------------------------------
# wrapper: NCHW in / NCHW out (PyTorch convention); kernel works in (S, C)
# ---------------------------------------------------------------------------
def vae_attention_block(x_nchw, params, *, tq=256, bf16_softmax=True):
    # tq=256 fills the v6e/v7x 256-wide MXU; use tq=128 (and bf16_softmax=False) on v5e.
    B, C, H, W = x_nchw.shape
    S = H * W
    S_pad = ((S + tq - 1) // tq) * tq       # pad S up to a multiple of tq (keys masked)
    nq = S_pad // tq
    chunk = 512 if S_pad % 512 == 0 else tq  # K/V projection chunk (divides S_pad)

    # channels-last token layout (layout plumbing outside the kernel)
    x_seq = jnp.transpose(x_nchw, (0, 2, 3, 1)).reshape(B, S, C)
    if S_pad != S:
        x_seq = jnp.pad(x_seq, ((0, 0), (0, S_pad - S), (0, 0)))

    w_in = params['w_in'].astype(jnp.bfloat16)      # (C, 3C)   q|k|v columns
    b_in = params['b_in'].astype(jnp.float32)       # (1, 3C)
    w_out = params['w_out'].astype(jnp.bfloat16)    # (C, C)
    b_out = params['b_out'].astype(jnp.float32)     # (1, C)

    kernel = functools.partial(_attn_kernel, seq_len=S, seq_pad=S_pad, tq=tq,
                               chunk=chunk, bf16_softmax=bf16_softmax)

    grid_spec = pltpu.PrefetchScalarGridSpec(
        num_scalar_prefetch=0,
        grid=(B, nq),
        in_specs=[
            pl.BlockSpec((1, S_pad, C), lambda b, q: (b, 0, 0)),  # full sample (Q/K/V/res)
            pl.BlockSpec((C, 3 * C), lambda b, q: (0, 0)),        # in_proj  W
            pl.BlockSpec((1, 3 * C), lambda b, q: (0, 0)),        # in_proj  b
            pl.BlockSpec((C, C), lambda b, q: (0, 0)),            # out_proj W
            pl.BlockSpec((1, C), lambda b, q: (0, 0)),            # out_proj b
        ],
        out_specs=pl.BlockSpec((1, tq, C), lambda b, q: (b, q, 0)),
        scratch_shapes=[
            pltpu.VMEM((C, S_pad), jnp.bfloat16),   # K^T (persists per batch element)
            pltpu.VMEM((S_pad, C), jnp.bfloat16),   # V
        ],
    )

    # explicit scoped-VMEM budget sized to the real problem (bounded by physical VMEM)
    vmem_needed = (
        2 * S_pad * C * 4                        # double-buffered x block
        + 2 * tq * C * 4                         # double-buffered output tile
        + 2 * (S_pad * C * 2)                    # K^T + V bf16 scratch
        + 2 * (w_in.size * 2 + w_out.size * 2)   # double-buffered bf16 weights
        + 2 * (b_in.size * 4 + b_out.size * 4)   # double-buffered fp32 biases
        + 6 * tq * S_pad * 4                     # score / exp transients + slack
        + (4 << 20)
    )
    vmem_limit = int(min(max(vmem_needed, 32 << 20), 64 << 20))

    flops = int(B * (2 * S_pad * C * 3 * C       # qkv projection
                     + 2 * S_pad * S_pad * C     # q @ k^T
                     + 2 * S_pad * S_pad * C     # p @ v
                     + 2 * S_pad * C * C))       # out projection
    bytes_accessed = int(2 * B * S_pad * C * 4                  # x read once + out write
                         + (w_in.size + w_out.size) * 2         # bf16 weights
                         + (b_in.size + b_out.size) * 4)

    out = pl.pallas_call(
        kernel,
        out_shape=jax.ShapeDtypeStruct((B, S_pad, C), jnp.float32),
        grid_spec=grid_spec,
        compiler_params=pltpu.CompilerParams(
            dimension_semantics=("parallel", "arbitrary"),
            vmem_limit_bytes=vmem_limit),
        cost_estimate=pl.CostEstimate(flops=flops,
                                      transcendentals=int(B * S_pad * S_pad),
                                      bytes_accessed=bytes_accessed),
    )(x_seq, w_in, b_in, w_out, b_out)

    out = out[:, :S, :]
    return jnp.transpose(out.reshape(B, H, W, C), (0, 3, 1, 2))


# ---------------------------------------------------------------------------
# pure-JAX fp32 reference for correctness checking
# ---------------------------------------------------------------------------
def _reference(x_nchw, p):
    B, C, H, W = x_nchw.shape
    x = jnp.transpose(x_nchw, (0, 2, 3, 1)).reshape(B, H * W, C)
    qkv = jnp.einsum('bsc,cd->bsd', x, p['w_in']) + p['b_in'][0]
    q, k, v = qkv[..., :C], qkv[..., C:2 * C], qkv[..., 2 * C:]
    s = jnp.einsum('bqc,bkc->bqk', q, k) / (C ** 0.5)
    a = jax.nn.softmax(s, axis=-1)
    o = jnp.einsum('bqk,bkc->bqc', a, v)
    o = jnp.einsum('bqc,cd->bqd', o, p['w_out']) + p['b_out'][0]
    y = x + o
    return jnp.transpose(y.reshape(B, H, W, C), (0, 3, 1, 2))


if __name__ == "__main__":
    key = jax.random.PRNGKey(0)
    # channels = 128 keeps the lane axis dense; spatial 16x16 -> S = 256 tokens.
    B, C, H, W = 2, 128, 16, 16
    ks = jax.random.split(key, 6)
    params = {
        'w_in':  0.05 * jax.random.normal(ks[0], (C, 3 * C), jnp.float32),
        'b_in':  0.02 * jax.random.normal(ks[1], (1, 3 * C), jnp.float32),
        'w_out': 0.05 * jax.random.normal(ks[2], (C, C), jnp.float32),
        'b_out': 0.02 * jax.random.normal(ks[3], (1, C), jnp.float32),
    }
    x = jax.random.normal(ks[4], (B, C, H, W), jnp.float32)   # PyTorch NCHW input

    # case 1: multiple query tiles (tq=128 -> nq=2) exercising K/V scratch reuse
    out = jax.block_until_ready(vae_attention_block(x, params, tq=128))
    ref = _reference(x, params)
    np.testing.assert_allclose(np.asarray(out), np.asarray(ref), rtol=2e-2, atol=2e-2)

    # case 2: non-divisible spatial size (12x12 -> S=144) exercising pad + key mask
    x2 = jax.random.normal(ks[5], (1, C, 12, 12), jnp.float32)
    out2 = jax.block_until_ready(vae_attention_block(x2, params))
    ref2 = _reference(x2, params)
    np.testing.assert_allclose(np.asarray(out2), np.asarray(ref2), rtol=2e-2, atol=2e-2)

    print("KERNEL_OK")
</pallas_src>

<mosaic_0001>
module attributes {stable_mosaic.version = 11 : i64} {
  func.func @_attn_kernel(%arg0: i32, %arg1: i32, %arg2: memref<1x256x128xf32, #tpu.memory_space<vmem>>, %arg3: memref<128x384xbf16, #tpu.memory_space<vmem>>, %arg4: memref<1x384xf32, #tpu.memory_space<vmem>>, %arg5: memref<128x128xbf16, #tpu.memory_space<vmem>>, %arg6: memref<1x128xf32, #tpu.memory_space<vmem>>, %arg7: memref<1x128x128xf32, #tpu.memory_space<vmem>>, %arg8: memref<128x256xbf16, #tpu.memory_space<vmem>>, %arg9: memref<256x128xbf16, #tpu.memory_space<vmem>>) attributes {dimension_semantics = [#tpu.dimension_semantics<parallel>, #tpu.dimension_semantics<arbitrary>], iteration_bounds = array<i64: 2, 2>, scalar_prefetch = 0 : i64, scratch_operands = 2 : i64, tpu.core_type = #tpu.core_type<tc>, window_params = [{transform_indices = @transform_0, window_bounds = array<i64: 1, 256, 128>}, {pipeline_mode = #tpu.pipeline_mode<synchronous>, transform_indices = @transform_1, window_bounds = array<i64: 128, 384>}, {pipeline_mode = #tpu.pipeline_mode<synchronous>, transform_indices = @transform_2, window_bounds = array<i64: 1, 384>}, {pipeline_mode = #tpu.pipeline_mode<synchronous>, transform_indices = @transform_3, window_bounds = array<i64: 128, 128>}, {pipeline_mode = #tpu.pipeline_mode<synchronous>, transform_indices = @transform_4, window_bounds = array<i64: 1, 128>}, {transform_indices = @transform_5, window_bounds = array<i64: 1, 128, 128>}]} {
    %c0_i32 = arith.constant 0 : i32
    %0 = arith.cmpi eq, %arg1, %c0_i32 : i32
    %1 = arith.extui %0 : i1 to i32
    %c0_i32_0 = arith.constant 0 : i32
    %2 = arith.cmpi ne, %1, %c0_i32_0 : i32
    scf.if %2 {
      %c0_23 = arith.constant 0 : index
      %c0_24 = arith.constant 0 : index
      %c0_25 = arith.constant 0 : index
      %43 = vector.load %arg2[%c0_23, %c0_24, %c0_25] : memref<1x256x128xf32, #tpu.memory_space<vmem>>, vector<1x128x128xf32>
      %44 = vector.shape_cast %43 : vector<1x128x128xf32> to vector<128x128xf32>
      %45 = arith.truncf %44 : vector<128x128xf32> to vector<128x128xbf16>
      %c0_26 = arith.constant 0 : index
      %c128 = arith.constant 128 : index
      %46 = vector.load %arg3[%c0_26, %c128] : memref<128x384xbf16, #tpu.memory_space<vmem>>, vector<128x128xbf16>
      %cst_27 = arith.constant dense<0.000000e+00> : vector<128x128xf32>
      %47 = tpu.matmul %45, %46, %cst_27 {dimension_numbers = #tpu.dot_dimension_numbers<[1], [0], [0], [1], [0, 0, 1, 1], [], []>} : vector<128x128xbf16>, vector<128x128xbf16>, vector<128x128xf32> -> vector<128x128xf32>
      %c0_28 = arith.constant 0 : index
      %c128_29 = arith.constant 128 : index
      %48 = vector.load %arg4[%c0_28, %c128_29] : memref<1x384xf32, #tpu.memory_space<vmem>>, vector<1x128xf32>
      %49 = vector.broadcast %48 : vector<1x128xf32> to vector<128x128xf32>
      %50 = arith.addf %47, %49 : vector<128x128xf32>
      %c0_30 = arith.constant 0 : index
      %c256 = arith.constant 256 : index
      %51 = vector.load %arg3[%c0_30, %c256] : memref<128x384xbf16, #tpu.memory_space<vmem>>, vector<128x128xbf16>
      %cst_31 = arith.constant dense<0.000000e+00> : vector<128x128xf32>
      %52 = tpu.matmul %45, %51, %cst_31 {dimension_numbers = #tpu.dot_dimension_numbers<[1], [0], [0], [1], [0, 0, 1, 1], [], []>} : vector<128x128xbf16>, vector<128x128xbf16>, vector<128x128xf32> -> vector<128x128xf32>
      %c0_32 = arith.constant 0 : index
      %c256_33 = arith.constant 256 : index
      %53 = vector.load %arg4[%c0_32, %c256_33] : memref<1x384xf32, #tpu.memory_space<vmem>>, vector<1x128xf32>
      %54 = vector.broadcast %53 : vector<1x128xf32> to vector<128x128xf32>
      %55 = arith.addf %52, %54 : vector<128x128xf32>
      %56 = tpu.transpose %50, [1, 0] : vector<128x128xf32> -> vector<128x128xf32>
      %57 = arith.truncf %56 : vector<128x128xf32> to vector<128x128xbf16>
      %c0_34 = arith.constant 0 : index
      %c0_35 = arith.constant 0 : index
      %58 = vector.load %arg8[%c0_34, %c0_35] : memref<128x256xbf16, #tpu.memory_space<vmem>>, vector<128x128xbf16>
      tpu.vector_store %arg8[%c0_34, %c0_35], %57 {strides = array<i32>} : memref<128x256xbf16, #tpu.memory_space<vmem>>, vector<128x128xbf16>,
      %59 = arith.truncf %55 : vector<128x128xf32> to vector<128x128xbf16>
      %c0_36 = arith.constant 0 : index
      %c0_37 = arith.constant 0 : index
      %60 = vector.load %arg9[%c0_36, %c0_37] : memref<256x128xbf16, #tpu.memory_space<vmem>>, vector<128x128xbf16>
      tpu.vector_store %arg9[%c0_36, %c0_37], %59 {strides = array<i32>} : memref<256x128xbf16, #tpu.memory_space<vmem>>, vector<128x128xbf16>,
      %c0_38 = arith.constant 0 : index
      %c128_39 = arith.constant 128 : index
      %c0_40 = arith.constant 0 : index
      %61 = vector.load %arg2[%c0_38, %c128_39, %c0_40] : memref<1x256x128xf32, #tpu.memory_space<vmem>>, vector<1x128x128xf32>
      %62 = vector.shape_cast %61 : vector<1x128x128xf32> to vector<128x128xf32>
      %63 = arith.truncf %62 : vector<128x128xf32> to vector<128x128xbf16>
      %c0_41 = arith.constant 0 : index
      %c128_42 = arith.constant 128 : index
      %64 = vector.load %arg3[%c0_41, %c128_42] : memref<128x384xbf16, #tpu.memory_space<vmem>>, vector<128x128xbf16>
      %cst_43 = arith.constant dense<0.000000e+00> : vector<128x128xf32>
      %65 = tpu.matmul %63, %64, %cst_43 {dimension_numbers = #tpu.dot_dimension_numbers<[1], [0], [0], [1], [0, 0, 1, 1], [], []>} : vector<128x128xbf16>, vector<128x128xbf16>, vector<128x128xf32> -> vector<128x128xf32>
      %c0_44 = arith.constant 0 : index
      %c128_45 = arith.constant 128 : index
      %66 = vector.load %arg4[%c0_44, %c128_45] : memref<1x384xf32, #tpu.memory_space<vmem>>, vector<1x128xf32>
      %67 = vector.broadcast %66 : vector<1x128xf32> to vector<128x128xf32>
      %68 = arith.addf %65, %67 : vector<128x128xf32>
      %c0_46 = arith.constant 0 : index
      %c256_47 = arith.constant 256 : index
      %69 = vector.load %arg3[%c0_46, %c256_47] : memref<128x384xbf16, #tpu.memory_space<vmem>>, vector<128x128xbf16>
      %cst_48 = arith.constant dense<0.000000e+00> : vector<128x128xf32>
      %70 = tpu.matmul %63, %69, %cst_48 {dimension_numbers = #tpu.dot_dimension_numbers<[1], [0], [0], [1], [0, 0, 1, 1], [], []>} : vector<128x128xbf16>, vector<128x128xbf16>, vector<128x128xf32> -> vector<128x128xf32>
      %c0_49 = arith.constant 0 : index
      %c256_50 = arith.constant 256 : index
      %71 = vector.load %arg4[%c0_49, %c256_50] : memref<1x384xf32, #tpu.memory_space<vmem>>, vector<1x128xf32>
      %72 = vector.broadcast %71 : vector<1x128xf32> to vector<128x128xf32>
      %73 = arith.addf %70, %72 : vector<128x128xf32>
      %74 = tpu.transpose %68, [1, 0] : vector<128x128xf32> -> vector<128x128xf32>
      %75 = arith.truncf %74 : vector<128x128xf32> to vector<128x128xbf16>
      %c0_51 = arith.constant 0 : index
      %c128_52 = arith.constant 128 : index
      %76 = vector.load %arg8[%c0_51, %c128_52] : memref<128x256xbf16, #tpu.memory_space<vmem>>, vector<128x128xbf16>
      tpu.vector_store %arg8[%c0_51, %c128_52], %75 {strides = array<i32>} : memref<128x256xbf16, #tpu.memory_space<vmem>>, vector<128x128xbf16>,
      %77 = arith.truncf %73 : vector<128x128xf32> to vector<128x128xbf16>
      %c128_53 = arith.constant 128 : index
      %c0_54 = arith.constant 0 : index
      %78 = vector.load %arg9[%c128_53, %c0_54] : memref<256x128xbf16, #tpu.memory_space<vmem>>, vector<128x128xbf16>
      tpu.vector_store %arg9[%c128_53, %c0_54], %77 {strides = array<i32>} : memref<256x128xbf16, #tpu.memory_space<vmem>>, vector<128x128xbf16>,
    } else {
    }
    %c128_i32 = arith.constant 128 : i32
    %3 = arith.muli %arg1, %c128_i32 : i32
    %4 = tpu.assume_multiple %3, 128 : i32
    %c0 = arith.constant 0 : index
    %5 = arith.index_cast %4 : i32 to index
    %c0_1 = arith.constant 0 : index
    %6 = vector.load %arg2[%c0, %5, %c0_1] : memref<1x256x128xf32, #tpu.memory_space<vmem>>, vector<1x128x128xf32>
    %7 = vector.shape_cast %6 : vector<1x128x128xf32> to vector<128x128xf32>
    %8 = arith.truncf %7 : vector<128x128xf32> to vector<128x128xbf16>
    %c0_2 = arith.constant 0 : index
    %c0_3 = arith.constant 0 : index
    %9 = vector.load %arg3[%c0_2, %c0_3] : memref<128x384xbf16, #tpu.memory_space<vmem>>, vector<128x128xbf16>
    %cst = arith.constant dense<0.000000e+00> : vector<128x128xf32>
    %10 = tpu.matmul %8, %9, %cst {dimension_numbers = #tpu.dot_dimension_numbers<[1], [0], [0], [1], [0, 0, 1, 1], [], []>} : vector<128x128xbf16>, vector<128x128xbf16>, vector<128x128xf32> -> vector<128x128xf32>
    %c0_4 = arith.constant 0 : index
    %c0_5 = arith.constant 0 : index
    %11 = vector.load %arg4[%c0_4, %c0_5] : memref<1x384xf32, #tpu.memory_space<vmem>>, vector<1x128xf32>
    %12 = vector.broadcast %11 : vector<1x128xf32> to vector<128x128xf32>
    %13 = arith.addf %10, %12 : vector<128x128xf32>
    %cst_6 = arith.constant 0.0883883461 : f32
    %14 = vector.broadcast %cst_6 : f32 to vector<128x128xf32>
    %15 = arith.mulf %13, %14 : vector<128x128xf32>
    %16 = arith.truncf %15 : vector<128x128xf32> to vector<128x128xbf16>
    %c0_7 = arith.constant 0 : index
    %c0_8 = arith.constant 0 : index
    %17 = vector.load %arg8[%c0_7, %c0_8] : memref<128x256xbf16, #tpu.memory_space<vmem>>, vector<128x256xbf16>
    %cst_9 = arith.constant dense<0.000000e+00> : vector<128x256xf32>
    %18 = tpu.matmul %16, %17, %cst_9 {dimension_numbers = #tpu.dot_dimension_numbers<[1], [0], [0], [1], [0, 0, 1, 1], [], []>} : vector<128x128xbf16>, vector<128x256xbf16>, vector<128x256xf32> -> vector<128x256xf32>
    %cst_10 = arith.constant dense<0xFF800000> : vector<128xf32>
    %19 = vector.multi_reduction <maximumf>, %18, %cst_10 [1] : vector<128x256xf32> to vector<128xf32>
    %20 = vector.shape_cast %19 : vector<128xf32> to vector<128x1xf32>
    %21 = vector.broadcast %20 : vector<128x1xf32> to vector<128x256xf32>
    %22 = arith.subf %18, %21 : vector<128x256xf32>
    %23 = arith.truncf %22 : vector<128x256xf32> to vector<128x256xbf16>
    %24 = math.exp %23 : vector<128x256xbf16>
    %25 = arith.extf %24 : vector<128x256xbf16> to vector<128x256xf32>
    %cst_11 = arith.constant dense<0.000000e+00> : vector<128xf32>
    %26 = vector.multi_reduction <add>, %25, %cst_11 [1] : vector<128x256xf32> to vector<128xf32>
    %27 = vector.shape_cast %26 : vector<128xf32> to vector<128x1xf32>
    %c0_12 = arith.constant 0 : index
    %c0_13 = arith.constant 0 : index
    %28 = vector.load %arg9[%c0_12, %c0_13] : memref<256x128xbf16, #tpu.memory_space<vmem>>, vector<256x128xbf16>
    %cst_14 = arith.constant dense<0.000000e+00> : vector<128x128xf32>
    %29 = tpu.matmul %24, %28, %cst_14 {dimension_numbers = #tpu.dot_dimension_numbers<[1], [0], [0], [1], [0, 0, 1, 1], [], []>} : vector<128x256xbf16>, vector<256x128xbf16>, vector<128x128xf32> -> vector<128x128xf32>
    %30 = tpu.reciprocal %27 {approx = true} : vector<128x1xf32> -> vector<128x1xf32>
    %31 = vector.broadcast %30 : vector<128x1xf32> to vector<128x128xf32>
    %32 = arith.mulf %29, %31 : vector<128x128xf32>
    %33 = arith.truncf %32 : vector<128x128xf32> to vector<128x128xbf16>
    %c0_15 = arith.constant 0 : index
    %c0_16 = arith.constant 0 : index
    %34 = vector.load %arg5[%c0_15, %c0_16] : memref<128x128xbf16, #tpu.memory_space<vmem>>, vector<128x128xbf16>
    %cst_17 = arith.constant dense<0.000000e+00> : vector<128x128xf32>
    %35 = tpu.matmul %33, %34, %cst_17 {dimension_numbers = #tpu.dot_dimension_numbers<[1], [0], [0], [1], [0, 0, 1, 1], [], []>} : vector<128x128xbf16>, vector<128x128xbf16>, vector<128x128xf32> -> vector<128x128xf32>
    %c0_18 = arith.constant 0 : index
    %c0_19 = arith.constant 0 : index
    %36 = vector.load %arg6[%c0_18, %c0_19] : memref<1x128xf32, #tpu.memory_space<vmem>>, vector<1x128xf32>
    %37 = vector.broadcast %36 : vector<1x128xf32> to vector<128x128xf32>
    %38 = arith.addf %35, %37 : vector<128x128xf32>
    %39 = arith.addf %38, %7 : vector<128x128xf32>
    %c0_20 = arith.constant 0 : index
    %c0_21 = arith.constant 0 : index
    %c0_22 = arith.constant 0 : index
    %40 = vector.load %arg7[%c0_20, %c0_21, %c0_22] : memref<1x128x128xf32, #tpu.memory_space<vmem>>, vector<1x128x128xf32>
    %41 = vector.shape_cast %40 : vector<1x128x128xf32> to vector<128x128xf32>
    %42 = vector.shape_cast %39 : vector<128x128xf32> to vector<1x128x128xf32>
    tpu.vector_store %arg7[%c0_20, %c0_21, %c0_22], %42 {strides = array<i32>} : memref<1x128x128xf32, #tpu.memory_space<vmem>>, vector<1x128x128xf32>,
    return
  }
  func.func @transform_0(%arg0: i32, %arg1: i32) -> (i32, i32, i32) {
    %c0_i32 = arith.constant 0 : i32
    %c0_i32_0 = arith.constant 0 : i32
    %c0_i32_1 = arith.constant 0 : i32
    return %arg0, %c0_i32, %c0_i32_0 : i32, i32, i32
  }
  func.func @transform_1(%arg0: i32, %arg1: i32) -> (i32, i32) {
    %c0_i32 = arith.constant 0 : i32
    %c0_i32_0 = arith.constant 0 : i32
    %c0_i32_1 = arith.constant 0 : i32
    return %c0_i32, %c0_i32_0 : i32, i32
  }
  func.func @transform_2(%arg0: i32, %arg1: i32) -> (i32, i32) {
    %c0_i32 = arith.constant 0 : i32
    %c0_i32_0 = arith.constant 0 : i32
    %c0_i32_1 = arith.constant 0 : i32
    return %c0_i32, %c0_i32_0 : i32, i32
  }
  func.func @transform_3(%arg0: i32, %arg1: i32) -> (i32, i32) {
    %c0_i32 = arith.constant 0 : i32
    %c0_i32_0 = arith.constant 0 : i32
    %c0_i32_1 = arith.constant 0 : i32
    return %c0_i32, %c0_i32_0 : i32, i32
  }
  func.func @transform_4(%arg0: i32, %arg1: i32) -> (i32, i32) {
    %c0_i32 = arith.constant 0 : i32
    %c0_i32_0 = arith.constant 0 : i32
    %c0_i32_1 = arith.constant 0 : i32
    return %c0_i32, %c0_i32_0 : i32, i32
  }
  func.func @transform_5(%arg0: i32, %arg1: i32) -> (i32, i32, i32) {
    %c0_i32 = arith.constant 0 : i32
    %c0_i32_0 = arith.constant 0 : i32
    return %arg0, %arg1, %c0_i32 : i32, i32, i32
  }
}

</mosaic_0001>

<bundles_post_ra>
// kernel: tpu_custom_call.1
= control target key start
LH: loop header
LB: loop body
LE: loop exit
PB: predicated region body
PF: predicated region fallthrough
CT: control target
= control target key end

     0   :  { %s4614_s0 = inlined_call_operand.hbm [shape: f32[2,256,128], index: 0, kind: input, shape index: {}]   ;;  %s4615_s1 = inlined_call_operand.hbm [shape: bf16[128,384], index: 1, kind: input, shape index: {}]   ;;  %s4616_s2 = inlined_call_operand.vmem [shape: f32[1,384], index: 2, kind: input, shape index: {}]   ;;  %s4617_s3 = inlined_call_operand.hbm [shape: bf16[128,128], index: 3, kind: input, shape index: {}]   ;;  %s4618_s4 = inlined_call_operand.vmem [shape: f32[1,128], index: 4, kind: input, shape index: {}]   ;;  %s4619_s5 = inlined_call_operand.hbm [shape: f32[2,256,128], index: 5, kind: output, shape index: {}]  }
   0x1   :  { %4630 = sst [smem:[#allocation20_spill]] %s4615_s1 }
   0x2   :  { %4631 = sst [smem:[#allocation21_spill]] %s4617_s3 }
   0x3   :  { %4632 = sst [smem:[#allocation22_spill]] %s4619_s5 }
   0x4   :  { %10 = vsyncpa [#allocation5], 0 }
   0x5   :  { %12 = vsyncpa [#allocation5 + $0x1], 0 }
   0x6   :  { %13 = vsyncpa [#allocation8], 0 }
   0x7   :  { %14 = vsyncpa [#allocation6], 0 }
   0x8   :  { %16 = vsyncpa [#allocation6 + $0x1], 0  ;;  %s3981_s18 = smov 0   ;;  %s3983_s19 = smov 0  }
   0x9   :  { %s3985_s20 = smov 0   ;;  %s3987_s21 = smov 0  }
   0xa   :  { %s3989_s22 = smov 0   ;;  %s3991_s23 = smov 0  }
   0xb   :  { %s3993_s24 = smov 0   ;;  %s3995_s25 = smov 0  }
   0xc   :  { %s3997_s26 = smov 0   ;;  %s3999_s27 = smov 0  }
   0xd   :  { %s4001_s28 = smov 0  }
   0xe LB: > { %4633 = sst [smem:[#allocation14_spill]] %s3896_s18  ;;  %s2636_s29 = sadd.s32 4294967295, %s3936_s28   ;;  %s3936_s28 = sphi %s4001_s28, %s22_s28   ;;  %s3932_s27 = sphi %s3999_s27, %s4669_s27   ;;  %s3928_s26 = sphi %s3997_s26, %s4668_s26   ;;  %s3924_s25 = sphi %s3995_s25, %s4667_s25   ;;  %s3920_s24 = sphi %s3993_s24, %s4659_s24   ;;  %s3916_s23 = sphi %s3991_s23, %s4666_s23   ;;  %s3912_s22 = sphi %s3989_s22, %s4665_s22   ;;  %s3908_s21 = sphi %s3987_s21, %s4664_s21   ;;  %s3904_s20 = sphi %s3985_s20, %s4663_s20   ;;  %s3900_s19 = sphi %s3983_s19, %s4662_s19   ;;  %s3896_s18 = sphi %s3981_s18, %s4661_s18  }
   0xf   : > { %4634 = sst [smem:[#allocation15_spill]] %s3924_s25  ;;  %s2637_s30 = sadd.s32 4294967294, %s3936_s28  }
  0x10   : > { %4635 = sst [smem:[#allocation16_spill]] %s3928_s26  ;;  %p54_p0 = scmp.ne.s32.totalorder %s3912_s22, %s3908_s21 }
  0x11   : > { %p4037_p1 = scmp.eq.s32.totalorder %s2636_s29, 0  ;;  %p163_p2 = scmp.ne.s32.totalorder %s3904_s20, %s3900_s19 }
  0x12   : > { %p164_p4 = scmp.eq.s32.totalorder %s2636_s29, 3  ;;  %p169_p5 = scmp.ne.s32.totalorder %s3900_s19, %s3896_s18 }
  0x13   : > { %s4636_s6 = scalar_select %p4037_p1, 1, 0 }
  0x14   : > { %p4046_p3 = por %p4037_p1, %p54_p0  ;;  %p170_p6 = scmp.eq.s32.totalorder %s2637_s30, 3 }
  0x15   : > { %p4052_p7 = por %p164_p4, %p163_p2  ;;  %p2638_p8 = scmp.ge.s32.totalorder %s3936_s28, 1 }
  0x16   : > { %p4057_p9 = por %p170_p6, %p169_p5  ;;  %p177_p10 = scmp.lt.s32.totalorder %s3936_s28, 5 }
  0x17   : > { %s4638_s9 = scalar_select %p4052_p7, 1, 0 }
  0x18   : > { %s4640_s10 = scalar_select %p4057_p9, 1, 0 }
  0x19   : > { %4639 = sst [smem:[#allocation17_spill]] %s4638_s9  ;;  %p4062_p11 = pnand %p2638_p8, %p177_p10 }
  0x1a   : > { %4641 = sst [smem:[#allocation18_spill]] %s4640_s10  ;;  %s3938_s12 = smov [#allocation7]  }
  0x1b   : > { %s189_s13 = sshll.u32 %s3938_s12, 4  ;;  %p3332_p12 = pneg %p4062_p11  ;;  %s190_s13 = int_to_ptr.vmem [resolvable:$true] %s189_s13 }
  0x1c   : > { %s3939_s15 = smov [#allocation9]   ;;  %s3743_s17 = scalar_lea.vmem %s190_s13, 3072 }
  0x1d   : > { %p4070_p13 = pnand %p3332_p12, %p4037_p1  ;;  %s205_s16 = sshll.u32 %s3939_s15, 4  ;;  %s206_s16 = int_to_ptr.vmem [resolvable:$true] %s205_s16 }
  0x1e   : > { %p3744_p2 = scmp.ne.s32.totalorder %s190_s13, %s3743_s17  ;;  %p3751_p6 = scmp.lt.s32.totalorder %s190_s13, %s190_s13 }
  0x1f   : > { %p3734_p0 = pneg %p4070_p13  ;;  %p3752_p8 = scmp.lt.s32.totalorder %s3743_s17, %s3743_s17 }
  0x21   : > { %p3746_p4 = pnand %p3744_p2, %p3734_p0  ;;  %p3753_p10 = por %p3752_p8, %p3751_p6 }
  0x23   : > { %p3747_p5 = pneg %p3746_p4 }
  0x25   : > { %p3754_p12 = pnand %p3753_p10, %p3747_p5 }
  0x27   : > { %3757 = shalt.err (!%p3754_p12)
}
  0x28   : > { %s3940_s21 = smov 192   ;;  %s3941_s29 = smov 12  }
  0x29   : > { %s4644_s1 = sld [smem:[#allocation20_spill]]  ;;  %s3769_s15 = scalar_lea.vmem %s206_s16, 1024 }
  0x2a   : > { %p3770_p9 = scmp.ne.s32.totalorder %s206_s16, %s3769_s15  ;;  %p3777_p7 = scmp.lt.s32.totalorder %s206_s16, %s206_s16 }
  0x2b   : > { %p3778_p1 = scmp.lt.s32.totalorder %s3769_s15, %s3769_s15 }
  0x2c   : > { %p3772_p2 = pnand %p3770_p9, %p3734_p0 }
  0x2d   : > { %p3779_p6 = por %p3778_p1, %p3777_p7 }
  0x2e   : > { %p3773_p4 = pneg %p3772_p2 }
  0x2f   : > { %3335 = dma.hbm_to_vmem [thread:$0]  (!%p4070_p13), %s4644_s1, 3072, %s190_s13, [#allocation8], %s3940_s21, %s3940_s21, %s3941_s29  }
  0x30   : > { %p3780_p5 = pnand %p3779_p6, %p3773_p4 }
  0x32   : > { %3783 = shalt.err (!%p3780_p5)
}
  0x33   : > { %s3942_s17 = smov 64   ;;  %s3943_s13 = smov 4  }
  0x34   : > { %s4645_s3 = sld [smem:[#allocation21_spill]]  ;;  %s31_s30 = sadd.s32 1, %s3928_s26 }
  0x35   : > { %s34_s12 = sadd.s32 1, %s3932_s27  ;;  %p32_p1 = scmp.ge.s32.totalorder %s31_s30, 2 }
  0x36   : > { %s41_s15 = sadd.s32 1, %s3916_s23  ;;  %p48_p7 = scmp.ne.s32.totalorder %s3916_s23, %s3912_s22 }
  0x37   : > { %p49_p9 = scmp.eq.s32.totalorder %s3936_s28, 0  ;;  %s4671_s30 = smov (%p32_p1, %s31_s30), 0 }
  0x38   : > { %4646 = sst [smem:[#allocation19_spill]] %s4671_s30  ;;  %s4673_s12 = smov (!%p32_p1, %s34_s12), %s3932_s27 }
  0x39   : > { %p4101_p0 = por %p49_p9, %p48_p7  ;;  %s149_s21 = ssub.s32 %s3928_s26, %s4671_s30 }
  0x3a   : > { %3338 = dma.hbm_to_vmem [thread:$0]  (!%p4070_p13), %s4645_s3, 1024, %s206_s16, [#allocation8], %s3942_s17, %s3942_s17, %s3943_s13  }
  0x3b   : > { %p36_p13 = scmp.ge.s32.totalorder %s4673_s12, 2  ;;  %p3349_p8 = scmp.lt.s32.totalorder %s3936_s28, 4 }
  0x3c   : > { %s222_s16 = sand.u32 1, %s3916_s23   ;;  %s2808_s17 = sshll.u32 %s3932_s27, 12 }
  0x3d   : > { %s4675_s12 = smov (%p36_p13, %s4673_s12), 0  ;;  %s2642_s13 = sshll.u32 %s222_s16, 8 }
  0x3e   : > { %s38_s29 = ssub.s32 %s3932_s27, %s4675_s12  ;;  %s232_s10 = scalar_lea.hbm %s4614_s0, %s2808_s17 }
  0x3f   : > { %p39_p10 = scmp.eq.s32.totalorder %s38_s29, 0  ;;  %s150_s7 = sor.u32 %s149_s21, %s38_s29 }
  0x40   : > { %p151_p12 = scmp.eq.s32.totalorder %s150_s7, 0  ;;  %s4648_s30 = sadd.s32 1, %s3904_s20 }
  0x41   : > { %s4118_s18 = scalar_select %p39_p10, %s3916_s23, %s41_s15  }
  0x42   : > { %s4123_s26 = scalar_select %p151_p12, %s3904_s20, %s4648_s30  }
  0x43   : > { %s226_s5 = scalar_lea.vmem [#allocation4], %s2642_s13  ;;  %p4129_p2 = pnand %p3349_p8, %p4101_p0 }
  0x44   : > { %s233_s9 = sshll.u32 %s226_s5, 4  ;;  %s223_s7 = scalar_lea.sflag [#allocation5], %s222_s16  ;;  %s234_s9 = int_to_ptr.vmem [resolvable:$true] %s233_s9 }
  0x45   : > { %p3786_p4 = pneg %p4129_p2  ;;  %s3797_s1 = scalar_lea.vmem %s234_s9, 4096 }
  0x46   : > { %p3798_p6 = scmp.ne.s32.totalorder %s234_s9, %s3797_s1  ;;  %s3944_s3 = smov [#allocation4]  }
  0x47   : > { %s3802_s30 = sshll.u32 %s3944_s3, 4  ;;  %s3803_s30 = int_to_ptr.vmem [resolvable:$false] %s3802_s30 }
  0x48   : > { %p3800_p5 = pnand %p3798_p6, %p3786_p4  ;;  %s3804_s15 = scalar_lea.vmem %s3803_s30, 8192 }
  0x49   : > { %p3805_p7 = scmp.lt.s32.totalorder %s234_s9, %s3803_s30  ;;  %p3806_p9 = scmp.lt.s32.totalorder %s3804_s15, %s3797_s1 }
  0x4a   : > { %p3801_p1 = pneg %p3800_p5 }
  0x4b   : > { %p3807_p13 = por %p3806_p9, %p3805_p7 }
  0x4d   : > { %p3808_p0 = pnand %p3807_p13, %p3801_p1 }
  0x4f   : > { %3811 = shalt.err (!%p3808_p0)
}
  0x50   : > { %s3945_s5 = smov 128   ;;  %s3946_s14 = smov 8  }
  0x51   : > { %3342 = dma.hbm_to_vmem [thread:$0]  (!%p4129_p2), %s232_s10, 4096, %s234_s9, %s223_s7, %s3945_s5, %s3945_s5, %s3946_s14  }
  0x52   : > { %245 = sbr.rel (%p4062_p11) target bundleno = 1630 (0x65e), region = 40  ;;  %s247_s21 = sand.u32 (!%p4062_p11), 1, %s3912_s22  }
  0x53   : > { %s2646_s16 = sshll.u32 (!%p4062_p11), %s247_s21, 8  ;;  %s248_s17 = scalar_lea.sflag (!%p4062_p11), [#allocation5], %s247_s21 }
  0x54   : > { %s4140_s13 = scalar_lea.vmem (!%p4062_p11), [#allocation4], %s2646_s16 }
  0x57   : > { %3883 = dma.done.wait (%p4046_p3), %s248_s17, 4096  }
  0x58   : > { %3885 = vsyncadd (%p4046_p3), %s248_s17, 4294963200  ;;  %p4650_p8 = scmp.ne.s32.totalorder %s4636_s6, 0 }
  0x5a   : > { %3887 = dma.done.wait (%p4650_p8), [#allocation8], 4096  }
  0x5b   : > { %3889 = vsyncadd (%p4650_p8), [#allocation8], 4294963200  ;;  %s283_s25 = sand.u32 1, %s3900_s19   ;;  %p2650_p11 = scmp.ne.s32.totalorder %s3920_s24, 0 }
  0x5c   : > { %s2649_s9 = sshll.u32 %s283_s25, 7 }
  0x5d   : > { %s4153_s10 = scalar_lea.vmem [#allocation10], %s2649_s9  ;;  %291 = sbr.rel (%p2650_p11) target bundleno = 552 (0x228), region = 56 }
  0x62   : > { %v3564_v0 = vld [vmem:[#allocation7 + $0xac] ss:$12 sps:$4 sm:$0xff]   ;;  %v3565_v1 = vld [vmem:[#allocation7 + $0x94] ss:$12 sps:$4 sm:$0xff]   ;;  %v3566_v2 = vld [vmem:[#allocation7 + $0x7c] ss:$12 sps:$4 sm:$0xff]  }
  0x63   : > { %3128 = vmatprep.subr.bf16.mxu0 %v3564_v0  ;;  %v3567_v3 = vld [vmem:[#allocation7 + $0x64] ss:$12 sps:$4 sm:$0xff]   ;;  %v293_v5 = vld [vmem:[%s4140_s13 + $0x8] sm:$0xff]  ;;  %v3569_v8 = vld [vmem:[#allocation7 + $0x34] ss:$12 sps:$4 sm:$0xff]  }
  0x64   : > { %3129 = vmatpush3.bf16.msra.mxu0 %v3564_v0  ;;  %v292_v4 = vld [vmem:[%s4140_s13] sm:$0xff]  ;;  %v3568_v7 = vld [vmem:[#allocation7 + $0x4c] ss:$12 sps:$4 sm:$0xff]   ;;  %v3570_v9 = vld [vmem:[#allocation7 + $0x1c] ss:$12 sps:$4 sm:$0xff]  }
  0x65   : > { %3130 = vmatprep.subr.bf16.mxu0 %v3565_v1  ;;  %v308_v6 = vpack.c.bf16 %v293_v5, %v292_v4  ;;  %v3571_v10 = vld [vmem:[#allocation7 + $0x4] ss:$12 sps:$4 sm:$0xff]   ;;  %v295_v12 = vld [vmem:[%s4140_s13 + $0x18] sm:$0xff]  ;;  %v297_v15 = vld [vmem:[%s4140_s13 + $0x28] sm:$0xff] }
  0x66   : > { %v294_v11 = vld [vmem:[%s4140_s13 + $0x10] sm:$0xff]  ;;  %v3572_v13 = vld [vmem:[#allocation7 + $0xac] ss:$12 sps:$4 sm:$0xff]   ;;  %v296_v14 = vld [vmem:[%s4140_s13 + $0x20] sm:$0xff] }
  0x67   : > { %3144 = vmatprep.mubr.bf16.mxu0 %v308_v6  ;;  %3176 = vmatprep.mubr.bf16.mxu1 %v308_v6  ;;  %v3580_v16 = vld [vmem:[#allocation7 + $0xb0] ss:$12 sps:$4 sm:$0xff]   ;;  %v3581_v17 = vld [vmem:[#allocation7 + $0x98] ss:$12 sps:$4 sm:$0xff]   ;;  %v4162_v18 = vpack.c.bf16 %v295_v12, %v294_v11  ;;  %v3573_v19 = vld [vmem:[#allocation7 + $0x94] ss:$12 sps:$4 sm:$0xff]   ;;  %v4164_v20 = vpack.c.bf16 %v297_v15, %v296_v14 }
  0x68   : > { %3131 = vmatpush3.bf16.msra.mxu0 %v3565_v1  ;;  %3160 = vmatprep.subr.bf16.mxu1 %v3580_v16  ;;  %v3582_v21 = vld [vmem:[#allocation7 + $0x80] ss:$12 sps:$4 sm:$0xff]   ;;  %v298_v22 = vld [vmem:[%s4140_s13 + $0x30] sm:$0xff]  ;;  %v299_v23 = vld [vmem:[%s4140_s13 + $0x38] sm:$0xff] }
  0x69   : > { %3132 = vmatprep.subr.bf16.mxu0 %v3566_v2  ;;  %3161 = vmatpush3.bf16.msra.mxu1 %v3580_v16  ;;  %v3574_v24 = vld [vmem:[#allocation7 + $0x7c] ss:$12 sps:$4 sm:$0xff]   ;;  %v300_v25 = vld [vmem:[%s4140_s13 + $0x40] sm:$0xff]  ;;  %v4172_v28 = vpack.c.bf16 %v299_v23, %v298_v22  ;;  %v302_v32 = vld [vmem:[%s4140_s13 + $0x50] sm:$0xff] }
  0x6a   : > { %3162 = vmatprep.subr.bf16.mxu1 %v3581_v17  ;;  %v3583_v26 = vld [vmem:[#allocation7 + $0x68] ss:$12 sps:$4 sm:$0xff]   ;;  %v3575_v29 = vld [vmem:[#allocation7 + $0x64] ss:$12 sps:$4 sm:$0xff]   ;;  %v303_v33 = vld [vmem:[%s4140_s13 + $0x58] sm:$0xff] }
  0x6b   : > { %v301_v27 = vld [vmem:[%s4140_s13 + $0x48] sm:$0xff]  ;;  %v3584_v31 = vld [vmem:[#allocation7 + $0x50] ss:$12 sps:$4 sm:$0xff]   ;;  %v3585_v34 = vld [vmem:[#allocation7 + $0x38] ss:$12 sps:$4 sm:$0xff]   ;;  %v4182_v38 = vpack.c.bf16 %v303_v33, %v302_v32 }
  0x6c   : > { %3133 = vmatpush3.bf16.msra.mxu0 %v3566_v2  ;;  %v4174_v30 = vpack.c.bf16 %v301_v27, %v300_v25  ;;  %v3576_v35 = vld [vmem:[#allocation7 + $0x4c] ss:$12 sps:$4 sm:$0xff]   ;;  %v304_v36 = vld [vmem:[%s4140_s13 + $0x60] sm:$0xff]  ;;  %v306_v42 = vld [vmem:[%s4140_s13 + $0x70] sm:$0xff] }
  0x6d   : > { %3134 = vmatprep.subr.bf16.mxu0 %v3567_v3  ;;  %3163 = vmatpush3.bf16.msra.mxu1 %v3581_v17  ;;  %v305_v37 = vld [vmem:[%s4140_s13 + $0x68] sm:$0xff]  ;;  %v3577_v40 = vld [vmem:[#allocation7 + $0x34] ss:$12 sps:$4 sm:$0xff]   ;;  %v307_v43 = vld [vmem:[%s4140_s13 + $0x78] sm:$0xff] }
  0x6e   : > { %3164 = vmatprep.subr.bf16.mxu1 %v3582_v21  ;;  %v4184_v39 = vpack.c.bf16 %v305_v37, %v304_v36  ;;  %v3586_v41 = vld [vmem:[#allocation7 + $0x20] ss:$12 sps:$4 sm:$0xff]   ;;  %v3587_v44 = vld [vmem:[#allocation7 + $0x8] ss:$12 sps:$4 sm:$0xff]   ;;  %v4192_v48 = vpack.c.bf16 %v307_v43, %v306_v42  ;;  %v3579_v50 = vld [vmem:[#allocation7 + $0x4] ss:$12 sps:$4 sm:$0xff]  }
  0x6f   : > { %v3578_v45 = vld [vmem:[#allocation7 + $0x1c] ss:$12 sps:$4 sm:$0xff]   ;;  %v844_v46 = vld [vmem:[%s4140_s13 + $0x80] sm:$0xff]  ;;  %v846_v52 = vld [vmem:[%s4140_s13 + $0x90] sm:$0xff] }
  0x70   : > { %3135 = vmatpush3.bf16.msra.mxu0 %v3567_v3  ;;  %v845_v47 = vld [vmem:[%s4140_s13 + $0x88] sm:$0xff]  ;;  %v3588_v51 = vld [vmem:[#allocation7 + $0xb0] ss:$12 sps:$4 sm:$0xff]   ;;  %v3589_v54 = vld [vmem:[#allocation7 + $0x98] ss:$12 sps:$4 sm:$0xff]  }
  0x71   : > { %3136 = vmatprep.subr.bf16.mxu0 %v3568_v7  ;;  %3165 = vmatpush3.bf16.msra.mxu1 %v3582_v21  ;;  %v4194_v49 = vpack.c.bf16 %v845_v47, %v844_v46  ;;  %v847_v53 = vld [vmem:[%s4140_s13 + $0x98] sm:$0xff]  ;;  %v848_v55 = vld [vmem:[%s4140_s13 + $0xa0] sm:$0xff]  ;;  %v849_v56 = vld [vmem:[%s4140_s13 + $0xa8] sm:$0xff] }
  0x72   : > { %3166 = vmatprep.subr.bf16.mxu1 %v3583_v26  ;;  %v861_v57 = vpack.c.bf16 %v847_v53, %v846_v52  ;;  %v862_v58 = vpack.c.bf16 %v849_v56, %v848_v55  ;;  %v3590_v59 = vld [vmem:[#allocation7 + $0x80] ss:$12 sps:$4 sm:$0xff]   ;;  %v850_v60 = vld [vmem:[%s4140_s13 + $0xb0] sm:$0xff]  ;;  %v851_v61 = vld [vmem:[%s4140_s13 + $0xb8] sm:$0xff] }
  0x73   : > { %v3591_v62 = vld [vmem:[#allocation7 + $0x68] ss:$12 sps:$4 sm:$0xff]   ;;  %v852_v63 = vld [vmem:[%s4140_s13 + $0xc0] sm:$0xff]  ;;  %v863_v1 = vpack.c.bf16 %v851_v61, %v850_v60  ;;  %v3592_v3 = vld [vmem:[#allocation7 + $0x50] ss:$12 sps:$4 sm:$0xff]  }
  0x74   : > { %3137 = vmatpush3.bf16.msra.mxu0 %v3568_v7  ;;  %v853_v0 = vld [vmem:[%s4140_s13 + $0xc8] sm:$0xff]  ;;  %v854_v4 = vld [vmem:[%s4140_s13 + $0xd0] sm:$0xff]  ;;  %v855_v5 = vld [vmem:[%s4140_s13 + $0xd8] sm:$0xff] }
  0x75   : > { %3138 = vmatprep.subr.bf16.mxu0 %v3569_v8  ;;  %3167 = vmatpush3.bf16.msra.mxu1 %v3583_v26  ;;  %v864_v2 = vpack.c.bf16 %v853_v0, %v852_v63  ;;  %v3593_v6 = vld [vmem:[#allocation7 + $0x38] ss:$12 sps:$4 sm:$0xff]   ;;  %v3594_v11 = vld [vmem:[#allocation7 + $0x20] ss:$12 sps:$4 sm:$0xff]   ;;  %v858_v12 = vld [vmem:[%s4140_s13 + $0xf0] sm:$0xff] }
  0x76   : > { %3168 = vmatprep.subr.bf16.mxu1 %v3584_v31  ;;  %v856_v7 = vld [vmem:[%s4140_s13 + $0xe0] sm:$0xff]  ;;  %v3595_v14 = vld [vmem:[#allocation7 + $0x8] ss:$12 sps:$4 sm:$0xff]  }
  0x78   : > { %3139 = vmatpush3.bf16.msra.mxu0 %v3569_v8  ;;  %v857_v8 = vld [vmem:[%s4140_s13 + $0xe8] sm:$0xff] }
  0x79   : > { %3140 = vmatprep.subr.bf16.mxu0 %v3570_v9  ;;  %3169 = vmatpush3.bf16.msra.mxu1 %v3584_v31  ;;  %v4243_v31 = vld [vmem:[%s4616_s2 + $0x2] ss:$0 sm:$0xff] }
  0x7a   : > { %3170 = vmatprep.subr.bf16.mxu1 %v3585_v34 }
  0x7c   : > { %3141 = vmatpush3.bf16.msra.mxu0 %v3570_v9  ;;  %v865_v9 = vpack.c.bf16 %v855_v5, %v854_v4 }
  0x7d   : > { %3142 = vmatprep.subr.bf16.mxu0 %v3571_v10  ;;  %3171 = vmatpush3.bf16.msra.mxu1 %v3585_v34 }
  0x7e   : > { %3172 = vmatprep.subr.bf16.mxu1 %v3586_v41 }
  0x80   : > { %3143 = vmatpush3.bf16.msra.mxu0 %v3571_v10  ;;  %v866_v10 = vpack.c.bf16 %v857_v8, %v856_v7 }
  0x81   : > { %3192 = vmatprep.subr.bf16.mxu0 %v3572_v13  ;;  %3173 = vmatpush3.bf16.msra.mxu1 %v3586_v41  ;;  %v4255_v41 = vld [vmem:[%s4616_s2 + $0x1] ss:$0 sm:$0xff] }
  0x82   : > { %3174 = vmatprep.subr.bf16.mxu1 %v3587_v44 }
  0x83   : > { %3145 = vmatmul.mubr.bf16.vlgmr.msra.gmra.mxu0 %v4162_v18 }
  0x84   : > { %3193 = vmatpush3.bf16.msra.mxu0 %v3572_v13  ;;  %3148 = vmatprep.mubr.bf16.mxu0 %v4164_v20  ;;  %v859_v13 = vld [vmem:[%s4140_s13 + $0xf8] sm:$0xff] }
  0x85   : > { %3194 = vmatprep.subr.bf16.mxu0 %v3573_v19  ;;  %3175 = vmatpush3.bf16.msra.mxu1 %v3587_v44  ;;  %v867_v15 = vpack.c.bf16 %v859_v13, %v858_v12 }
  0x86   : > { %3224 = vmatprep.subr.bf16.mxu1 %v3588_v51 }
  0x88   : > { %3195 = vmatpush3.bf16.msra.mxu0 %v3573_v19  ;;  %3177 = vmatmul.mubr.bf16.vlgmr.msra.gmra.mxu1 %v4162_v18 }
  0x89   : > { %3196 = vmatprep.subr.bf16.mxu0 %v3574_v24  ;;  %3225 = vmatpush3.bf16.msra.mxu1 %v3588_v51 }
  0x8a   : > { %3180 = vmatprep.mubr.bf16.mxu1 %v4164_v20  ;;  %3226 = vmatprep.subr.bf16.mxu1 %v3589_v54 }
  0x8b   : > { %3149 = vmatmul.mubr.bf16.gmra.mxu0 %v4172_v28 }
  0x8c   : > { %3197 = vmatpush3.bf16.msra.mxu0 %v3574_v24  ;;  %3152 = vmatprep.mubr.bf16.mxu0 %v4174_v30 }
  0x8d   : > { %3198 = vmatprep.subr.bf16.mxu0 %v3575_v29  ;;  %3227 = vmatpush3.bf16.msra.mxu1 %v3589_v54 }
  0x8e   : > { %3228 = vmatprep.subr.bf16.mxu1 %v3590_v59 }
  0x90   : > { %3199 = vmatpush3.bf16.msra.mxu0 %v3575_v29  ;;  %3181 = vmatmul.mubr.bf16.gmra.mxu1 %v4172_v28 }
  0x91   : > { %3200 = vmatprep.subr.bf16.mxu0 %v3576_v35  ;;  %3229 = vmatpush3.bf16.msra.mxu1 %v3590_v59 }
  0x92   : > { %3184 = vmatprep.mubr.bf16.mxu1 %v4174_v30  ;;  %3230 = vmatprep.subr.bf16.mxu1 %v3591_v62 }
  0x93   : > { %3153 = vmatmul.mubr.bf16.gmra.mxu0 %v4182_v38 }
  0x94   : > { %3201 = vmatpush3.bf16.msra.mxu0 %v3576_v35  ;;  %3156 = vmatprep.mubr.bf16.mxu0 %v4184_v39 }
  0x95   : > { %3202 = vmatprep.subr.bf16.mxu0 %v3577_v40  ;;  %3231 = vmatpush3.bf16.msra.mxu1 %v3591_v62 }
  0x96   : > { %3232 = vmatprep.subr.bf16.mxu1 %v3592_v3 }
  0x98   : > { %3203 = vmatpush3.bf16.msra.mxu0 %v3577_v40  ;;  %3185 = vmatmul.mubr.bf16.gmra.mxu1 %v4182_v38 }
  0x99   : > { %3204 = vmatprep.subr.bf16.mxu0 %v3578_v45  ;;  %3233 = vmatpush3.bf16.msra.mxu1 %v3592_v3 }
  0x9a   : > { %3188 = vmatprep.mubr.bf16.mxu1 %v4184_v39  ;;  %3234 = vmatprep.subr.bf16.mxu1 %v3593_v6 }
  0x9b   : > { %3157 = vmatmul.mubr.bf16.gmra.mxu0 %v4192_v48 }
  0x9c   : > { %3205 = vmatpush3.bf16.msra.mxu0 %v3578_v45  ;;  %3208 = vmatprep.mubr.bf16.mxu0 %v4194_v49 }
  0x9d   : > { %3206 = vmatprep.subr.bf16.mxu0 %v3579_v50  ;;  %3235 = vmatpush3.bf16.msra.mxu1 %v3593_v6 }
  0x9e   : > { %3236 = vmatprep.subr.bf16.mxu1 %v3594_v11 }
  0xa0   : > { %3207 = vmatpush3.bf16.msra.mxu0 %v3579_v50  ;;  %3189 = vmatmul.mubr.bf16.gmra.mxu1 %v4192_v48 }
  0xa1   : > { %3237 = vmatpush3.bf16.msra.mxu1 %v3594_v11  ;;  %3240 = vmatprep.mubr.bf16.mxu1 %v4194_v49 }
  0xa2   : > { %3238 = vmatprep.subr.bf16.mxu1 %v3595_v14 }
  0xa3   : > { %3209 = vmatmul.mubr.bf16.vlgmr.msra.gmra.mxu0 %v861_v57 }
  0xa4   : > { %3212 = vmatprep.mubr.bf16.mxu0 %v862_v58 }
  0xa5   : > { %3239 = vmatpush3.bf16.msra.mxu1 %v3595_v14 }
  0xa8   : > { %3241 = vmatmul.mubr.bf16.vlgmr.msra.gmra.mxu1 %v861_v57 }
  0xa9   : > { %3244 = vmatprep.mubr.bf16.mxu1 %v862_v58 }
  0xab   : > { %3213 = vmatmul.mubr.bf16.gmra.mxu0 %v863_v1 }
  0xac   : > { %3216 = vmatprep.mubr.bf16.mxu0 %v864_v2 }
  0xb0   : > { %3245 = vmatmul.mubr.bf16.gmra.mxu1 %v863_v1 }
  0xb1   : > { %3248 = vmatprep.mubr.bf16.mxu1 %v864_v2 }
  0xb3   : > { %3217 = vmatmul.mubr.bf16.gmra.mxu0 %v865_v9 }
  0xb4   : > { %3220 = vmatprep.mubr.bf16.mxu0 %v866_v10 }
  0xb8   : > { %3249 = vmatmul.mubr.bf16.gmra.mxu1 %v865_v9 }
  0xb9   : > { %3252 = vmatprep.mubr.bf16.mxu1 %v866_v10 }
  0xbb   : > { %3221 = vmatmul.mubr.bf16.gmra.mxu0 %v867_v15 }
  0xc0   : > { %3253 = vmatmul.mubr.bf16.gmra.mxu1 %v867_v15 }
 0x143   : > { %v3146_v16 = vpop.f32.mrf.mxu0 }
 0x144   : > { %v430_v2 = vadd.f32 %v3146_v16, %v4255_v41 }
 0x145   : > { %v421_v17 = vpop.f32.mrf.mxu0 }
 0x146   : > { %v422_v45 = vadd.f32 %v4255_v41, %v421_v17 }
 0x147   : > { %v3147_v18 = vpop.f32.mrf.mxu0 }
 0x148   : > { %v3178_v30 = vpop.f32.mrf.mxu1  ;;  %v433_v10 = vadd.f32 %v3147_v18, %v4255_v41 }
 0x149   : > { %v424_v19 = vpop.f32.mrf.mxu0  ;;  %v598_v35 = vadd.f32 %v3178_v30, %v4243_v31 }
 0x14a   : > { %v589_v33 = vpop.f32.mrf.mxu1  ;;  %v425_v54 = vadd.f32 %v4255_v41, %v424_v19 }
 0x14b   : > { %v4220_v20 = vpop.f32.mrf.mxu0  ;;  %v590_v38 = vadd.f32 %v4243_v31, %v589_v33 }
 0x14c   : > { %v3179_v36 = vpop.f32.mrf.mxu1 }
 0x14d   : > { %v4222_v21 = vpop.f32.mrf.mxu0  ;;  %v601_v39 = vadd.f32 %v3179_v36, %v4243_v31 }
 0x14e   : > { %v592_v40 = vpop.f32.mrf.mxu1  ;;  %v438_v33 = vadd.f32 %v4255_v41, %v4222_v21 }
 0x14f   : > { %v4224_v22 = vpop.f32.mrf.mxu0  ;;  %v2881_v43 = vpack.c.bf16 %v601_v39, %v598_v35  ;;  %v593_v44 = vadd.f32 %v4243_v31, %v592_v40 }
 0x150   : > { %v3182_v47 = vpop.f32.mrf.mxu1 }
 0x151   : > { %v4226_v23 = vpop.f32.mrf.mxu0  ;;  %2953 = vst [vmem:[#allocation3 + $0x8] sm:$0xff] %v2881_v43   ;;  %v2876_v49 = vpack.c.bf16 %v593_v44, %v590_v38  ;;  %v614_v53 = vadd.f32 %v3182_v47, %v4243_v31 }
 0x152   : > { %v605_v51 = vpop.f32.mrf.mxu1 }
 0x153   : > { %v4228_v24 = vpop.f32.mrf.mxu0  ;;  %2877 = vst [vmem:[#allocation3] sm:$0xff] %v2876_v49   ;;  %v606_v58 = vadd.f32 %v4243_v31, %v605_v51  ;;  %v446_v51 = vadd.f32 %v4220_v20, %v4255_v41 }
 0x154   : > { %v3183_v56 = vpop.f32.mrf.mxu1 }
 0x155   : > { %v4230_v25 = vpop.f32.mrf.mxu0  ;;  %v617_v59 = vadd.f32 %v3183_v56, %v4243_v31 }
 0x156   : > { %v608_v62 = vpop.f32.mrf.mxu1 }
 0x157   : > { %v4232_v26 = vpop.f32.mrf.mxu0  ;;  %v2891_v0 = vpack.c.bf16 %v617_v59, %v614_v53  ;;  %v609_v1 = vadd.f32 %v4243_v31, %v608_v62 }
 0x158   : > { %v3186_v3 = vpop.f32.mrf.mxu1 }
 0x159   : > { %v4234_v27 = vpop.f32.mrf.mxu0  ;;  %2955 = vst [vmem:[#allocation3 + $0x18] sm:$0xff] %v2891_v0   ;;  %v2886_v4 = vpack.c.bf16 %v609_v1, %v606_v58  ;;  %v630_v9 = vadd.f32 %v3186_v3, %v4243_v31  ;;  %v449_v58 = vadd.f32 %v4224_v22, %v4255_v41  ;;  %v454_v3 = vadd.f32 %v4255_v41, %v4230_v25 }
 0x15a   : > { %v621_v7 = vpop.f32.mrf.mxu1 }
 0x15b   : > { %v4236_v28 = vpop.f32.mrf.mxu0  ;;  %2954 = vst [vmem:[#allocation3 + $0x10] sm:$0xff] %v2886_v4   ;;  %v622_v12 = vadd.f32 %v4243_v31, %v621_v7 }
 0x15c   : > { %v3187_v11 = vpop.f32.mrf.mxu1 }
 0x15d   : > { %v4238_v29 = vpop.f32.mrf.mxu0  ;;  %v633_v13 = vadd.f32 %v3187_v11, %v4243_v31 }
 0x15e   : > { %v624_v16 = vpop.f32.mrf.mxu1 }
 0x15f   : > { %v4245_v32 = vpop.f32.mrf.mxu0  ;;  %v2901_v19 = vpack.c.bf16 %v633_v13, %v630_v9  ;;  %v625_v30 = vadd.f32 %v4243_v31, %v624_v16 }
 0x160   : > { %v3190_v35 = vpop.f32.mrf.mxu1 }
 0x161   : > { %v4247_v34 = vpop.f32.mrf.mxu0  ;;  %2957 = vst [vmem:[#allocation3 + $0x28] sm:$0xff] %v2901_v19   ;;  %v2896_v18 = vpack.c.bf16 %v625_v30, %v622_v12  ;;  %v646_v40 = vadd.f32 %v3190_v35, %v4243_v31  ;;  %v462_v30 = vadd.f32 %v4228_v24, %v4255_v41 }
 0x162   : > { %v637_v38 = vpop.f32.mrf.mxu1 }
 0x163   : > { %v3210_v37 = vpop.f32.mrf.mxu0  ;;  %2956 = vst [vmem:[#allocation3 + $0x20] sm:$0xff] %v2896_v18   ;;  %v638_v44 = vadd.f32 %v4243_v31, %v637_v38 }
 0x164   : > { %v982_v60 = vadd.f32 %v3210_v37, %v4255_v41  ;;  %v3191_v43 = vpop.f32.mrf.mxu1 }
 0x165   : > { %v973_v42 = vpop.f32.mrf.mxu0  ;;  %v649_v21 = vadd.f32 %v3191_v43, %v4243_v31 }
 0x166   : > { %v974_v46 = vadd.f32 %v4255_v41, %v973_v42  ;;  %v3456_v6 = vpack.i.bf16 %v982_v60, %v430_v2  ;;  %v441_v42 = vadd.f32 %v4255_v41, %v4226_v23  ;;  %v640_v47 = vpop.f32.mrf.mxu1 }
 0x167   : > { %v3211_v48 = vpop.f32.mrf.mxu0  ;;  %v2911_v49 = vpack.c.bf16 %v649_v21, %v646_v40 }
 0x168   : > { %v3452_v50 = vpack.i.bf16 %v974_v46, %v422_v45  ;;  %v985_v5 = vadd.f32 %v3211_v48, %v4255_v41 }
 0x169   : > { %v976_v52 = vpop.f32.mrf.mxu0  ;;  %2959 = vst [vmem:[#allocation3 + $0x38] sm:$0xff] %v2911_v49  }
 0x16a   : > { %v977_v55 = vadd.f32 %v4255_v41, %v976_v52  ;;  %3453 = vxpose.xlu0.b32.start [1/16] %v3452_v50, 128  ;;  %v3458_v15 = vpack.i.bf16 %v985_v5, %v433_v10  ;;  %v641_v50 = vadd.f32 %v4243_v31, %v640_v47  ;;  %v3242_v52 = vpop.f32.mrf.mxu1  ;;  %v457_v10 = vadd.f32 %v4255_v41, %v4234_v27 }
 0x16b   : > { %v3214_v57 = vpop.f32.mrf.mxu0 }
 0x16c   : > { %v3454_v61 = vpack.i.bf16 %v977_v55, %v425_v54  ;;  %v998_v45 = vadd.f32 %v3214_v57, %v4255_v41  ;;  %v2906_v23 = vpack.c.bf16 %v641_v50, %v638_v44  ;;  %v1141_v55 = vpop.f32.mrf.mxu1  ;;  %v1150_v57 = vadd.f32 %v3242_v52, %v4243_v31 }
 0x16d   : > { %v989_v63 = vpop.f32.mrf.mxu0  ;;  %v1142_v60 = vadd.f32 %v4243_v31, %v1141_v55 }
 0x16e   : > { %3455 = vxpose.xlu0.b32.cont [2/16] %v3454_v61, 128  ;;  %v990_v14 = vadd.f32 %v4255_v41, %v989_v63  ;;  %v3464_v54 = vpack.i.bf16 %v998_v45, %v446_v51  ;;  %2958 = vst [vmem:[#allocation3 + $0x30] sm:$0xff] %v2906_v23   ;;  %v3243_v59 = vpop.f32.mrf.mxu1 }
 0x16f   : > { %v3215_v8 = vpop.f32.mrf.mxu0  ;;  %v1153_v20 = vadd.f32 %v3243_v59, %v4243_v31 }
 0x170   : > { %v3460_v37 = vpack.i.bf16 %v990_v14, %v438_v33  ;;  %v1001_v53 = vadd.f32 %v3215_v8, %v4255_v41  ;;  %v1144_v63 = vpop.f32.mrf.mxu1 }
 0x171   : > { %v992_v17 = vpop.f32.mrf.mxu0  ;;  %v2921_v1 = vpack.c.bf16 %v1153_v20, %v1150_v57  ;;  %v1145_v2 = vadd.f32 %v4243_v31, %v1144_v63  ;;  %v478_v20 = vadd.f32 %v4236_v28, %v4255_v41  ;;  %v481_v63 = vadd.f32 %v4245_v32, %v4255_v41 }
 0x172   : > { %3457 = vxpose.xlu0.b32.cont [3/16] %v3456_v6, 128  ;;  %v993_v36 = vadd.f32 %v4255_v41, %v992_v17  ;;  %v3466_v62 = vpack.i.bf16 %v1001_v53, %v449_v58  ;;  %v3246_v4 = vpop.f32.mrf.mxu1  ;;  %v473_v53 = vadd.f32 %v4255_v41, %v4247_v34 }
 0x173   : > { %v3218_v39 = vpop.f32.mrf.mxu0  ;;  %2961 = vst [vmem:[#allocation3 + $0x48] sm:$0xff] %v2921_v1   ;;  %v2916_v22 = vpack.c.bf16 %v1145_v2, %v1142_v60  ;;  %v1166_v9 = vadd.f32 %v3246_v4, %v4243_v31 }
 0x174   : > { %v3462_v46 = vpack.i.bf16 %v993_v36, %v441_v42  ;;  %v1157_v7 = vpop.f32.mrf.mxu1  ;;  %v1014_v13 = vadd.f32 %v3218_v39, %v4255_v41  ;;  %v465_v39 = vadd.f32 %v4232_v26, %v4255_v41 }
 0x175   : > { %v1005_v48 = vpop.f32.mrf.mxu0  ;;  %2960 = vst [vmem:[#allocation3 + $0x40] sm:$0xff] %v2916_v22   ;;  %v1158_v12 = vadd.f32 %v4243_v31, %v1157_v7 }
 0x176   : > { %3459 = vxpose.xlu0.b32.cont [4/16] %v3458_v15, 128  ;;  %v1006_v61 = vadd.f32 %v4255_v41, %v1005_v48  ;;  %v3247_v11 = vpop.f32.mrf.mxu1  ;;  %v3472_v18 = vpack.i.bf16 %v1014_v13, %v462_v30  ;;  %v470_v48 = vadd.f32 %v4255_v41, %v4238_v29 }
 0x177   : > { %v3219_v56 = vpop.f32.mrf.mxu0  ;;  %v1169_v25 = vadd.f32 %v3247_v11, %v4243_v31 }
 0x178   : > { %v3468_v6 = vpack.i.bf16 %v1006_v61, %v454_v3  ;;  %v1160_v15 = vpop.f32.mrf.mxu1  ;;  %v1017_v35 = vadd.f32 %v3219_v56, %v4255_v41 }
 0x179   : > { %v1008_v0 = vpop.f32.mrf.mxu0  ;;  %v2931_v17 = vpack.c.bf16 %v1169_v25, %v1166_v9  ;;  %v1161_v19 = vadd.f32 %v4243_v31, %v1160_v15 }
 0x17a   : > { %3461 = vxpose.xlu0.b32.cont [5/16] %v3460_v37, 128  ;;  %v1009_v5 = vadd.f32 %v4255_v41, %v1008_v0  ;;  %v3250_v33 = vpop.f32.mrf.mxu1  ;;  %v3474_v44 = vpack.i.bf16 %v1017_v35, %v465_v39 }
 0x17b   : > { %v3222_v8 = vpop.f32.mrf.mxu0  ;;  %2963 = vst [vmem:[#allocation3 + $0x58] sm:$0xff] %v2931_v17   ;;  %v2926_v27 = vpack.c.bf16 %v1161_v19, %v1158_v12  ;;  %v1182_v38 = vadd.f32 %v3250_v33, %v4243_v31 }
 0x17c   : > { %v3470_v14 = vpack.i.bf16 %v1009_v5, %v457_v10  ;;  %v1173_v36 = vpop.f32.mrf.mxu1  ;;  %v1030_v56 = vadd.f32 %v3222_v8, %v4255_v41 }
 0x17d   : > { %v1021_v16 = vpop.f32.mrf.mxu0  ;;  %2962 = vst [vmem:[#allocation3 + $0x50] sm:$0xff] %v2926_v27   ;;  %v1174_v42 = vadd.f32 %v4243_v31, %v1173_v36 }
 0x17e   : > { %3463 = vxpose.xlu0.b32.cont [6/16] %v3462_v46, 128  ;;  %v3251_v40 = vpop.f32.mrf.mxu1  ;;  %v1022_v43 = vadd.f32 %v4255_v41, %v1021_v16 }
 0x17f   : > { %v3223_v37 = vpop.f32.mrf.mxu0  ;;  %v1185_v24 = vadd.f32 %v3251_v40, %v4243_v31 }
 0x180   : > { %v1176_v21 = vpop.f32.mrf.mxu1  ;;  %v3476_v51 = vpack.i.bf16 %v1022_v43, %v470_v48  ;;  %v1033_v34 = vadd.f32 %v3223_v37, %v4255_v41 }
 0x181   : > { %v1024_v45 = vpop.f32.mrf.mxu0  ;;  %v2941_v46 = vpack.c.bf16 %v1185_v24, %v1182_v38  ;;  %v1177_v47 = vadd.f32 %v4243_v31, %v1176_v21 }
 0x182   : > { %3465 = vxpose.xlu0.b32.cont [7/16] %v3464_v54, 128  ;;  %v3254_v49 = vpop.f32.mrf.mxu1  ;;  %v1025_v50 = vadd.f32 %v4255_v41, %v1024_v45  ;;  %v3482_v0 = vpack.i.bf16 %v1033_v34, %v481_v63 }
 0x183   : > { %2965 = vst [vmem:[#allocation3 + $0x68] sm:$0xff] %v2941_v46   ;;  %v2936_v26 = vpack.c.bf16 %v1177_v47, %v1174_v42  ;;  %v1198_v23 = vadd.f32 %v3254_v49, %v4243_v31 }
 0x184   : > { %v1189_v52 = vpop.f32.mrf.mxu1  ;;  %v3478_v57 = vpack.i.bf16 %v1025_v50, %v473_v53 }
 0x185   : > { %2964 = vst [vmem:[#allocation3 + $0x60] sm:$0xff] %v2936_v26   ;;  %v1190_v55 = vadd.f32 %v4243_v31, %v1189_v52 }
 0x186   : > { %3467 = vxpose.xlu0.b32.cont [8/16] %v3466_v62, 128  ;;  %v3255_v54 = vpop.f32.mrf.mxu1  ;;  %v3480_v62 = vpack.i.bf16 %v1030_v56, %v478_v20 }
 0x187   : > { %v1201_v29 = vadd.f32 %v3255_v54, %v4243_v31 }
 0x188   : > { %v1192_v58 = vpop.f32.mrf.mxu1 }
 0x189   : > { %v2951_v59 = vpack.c.bf16 %v1201_v29, %v1198_v23  ;;  %v1193_v60 = vadd.f32 %v4243_v31, %v1192_v58 }
 0x18a   : > { %3469 = vxpose.xlu0.b32.cont [9/16] %v3468_v6, 128 }
 0x18b   : > { %2967 = vst [vmem:[#allocation3 + $0x78] sm:$0xff] %v2951_v59   ;;  %v2946_v61 = vpack.c.bf16 %v1193_v60, %v1190_v55 }
 0x18d   : > { %2966 = vst [vmem:[#allocation3 + $0x70] sm:$0xff] %v2946_v61  }
 0x18e   : > { %3471 = vxpose.xlu0.b32.cont [10/16] %v3470_v14, 128 }
 0x192   : > { %3473 = vxpose.xlu0.b32.cont [11/16] %v3472_v18, 128 }
 0x196   : > { %3475 = vxpose.xlu0.b32.cont [12/16] %v3474_v44, 128 }
 0x19a   : > { %3477 = vxpose.xlu0.b32.cont [13/16] %v3476_v51, 128 }
 0x19e   : > { %3479 = vxpose.xlu0.b32.cont [14/16] %v3478_v57, 128 }
 0x1a2   : > { %3481 = vxpose.xlu0.b32.cont [15/16] %v3480_v62, 128 }
 0x1a6   : > { %3483 = vxpose.xlu0.b32.end [16/16] %v3482_v0, 128 }
 0x1e6   : > { %v3484_v1 = vpop.trf.xlu0 }
 0x1e7   : > { %v3488_v2 = vunpack.i.h.bf16 %v3484_v1  ;;  %v3485_v3 = vunpack.i.l.bf16 %v3484_v1 }
 0x1e9   : > { %v2841_v31 = vpack.c.bf16 %v3488_v2, %v3488_v2  ;;  %v2809_v4 = vpack.c.bf16 %v3485_v3, %v3485_v3 }
 0x1ea   : > { %v3489_v22 = vpop.trf.xlu0 }
 0x1eb   : > { %1300 = vst [vmem:[#allocation2 + $0x4] sm:$0xf] %v2841_v31  ;;  %748 = vst [vmem:[#allocation2] sm:$0xf] %v2809_v4  ;;  %v3493_v28 = vunpack.i.h.bf16 %v3489_v22  ;;  %v3490_v5 = vunpack.i.l.bf16 %v3489_v22 }
 0x1ed   : > { %v2842_v6 = vpack.c.bf16 %v3493_v28, %v3493_v28  ;;  %v2810_v7 = vpack.c.bf16 %v3490_v5, %v3490_v5 }
 0x1ee   : > { %v3494_v8 = vpop.trf.xlu0 }
 0x1ef   : > { %1301 = vst [vmem:[#allocation2 + $0xc] sm:$0xf] %v2842_v6  ;;  %749 = vst [vmem:[#allocation2 + $0x8] sm:$0xf] %v2810_v7  ;;  %v3498_v9 = vunpack.i.h.bf16 %v3494_v8  ;;  %v3495_v32 = vunpack.i.l.bf16 %v3494_v8 }
 0x1f1   : > { %v2843_v41 = vpack.c.bf16 %v3498_v9, %v3498_v9  ;;  %v2811_v10 = vpack.c.bf16 %v3495_v32, %v3495_v32 }
 0x1f2   : > { %v3499_v11 = vpop.trf.xlu0 }
 0x1f3   : > { %1302 = vst [vmem:[#allocation2 + $0x14] sm:$0xf] %v2843_v41  ;;  %750 = vst [vmem:[#allocation2 + $0x10] sm:$0xf] %v2811_v10  ;;  %v3503_v12 = vunpack.i.h.bf16 %v3499_v11  ;;  %v3500_v25 = vunpack.i.l.bf16 %v3499_v11 }
 0x1f5   : > { %v2844_v13 = vpack.c.bf16 %v3503_v12, %v3503_v12  ;;  %v2812_v14 = vpack.c.bf16 %v3500_v25, %v3500_v25 }
 0x1f6   : > { %v3504_v15 = vpop.trf.xlu0 }
 0x1f7   : > { %1303 = vst [vmem:[#allocation2 + $0x1c] sm:$0xf] %v2844_v13  ;;  %751 = vst [vmem:[#allocation2 + $0x18] sm:$0xf] %v2812_v14  ;;  %v3508_v16 = vunpack.i.h.bf16 %v3504_v15  ;;  %v3505_v17 = vunpack.i.l.bf16 %v3504_v15 }
 0x1f9   : > { %v2845_v19 = vpack.c.bf16 %v3508_v16, %v3508_v16  ;;  %v2813_v30 = vpack.c.bf16 %v3505_v17, %v3505_v17 }
 0x1fa   : > { %v3509_v33 = vpop.trf.xlu0 }
 0x1fb   : > { %1304 = vst [vmem:[#allocation2 + $0x24] sm:$0xf] %v2845_v19  ;;  %752 = vst [vmem:[#allocation2 + $0x20] sm:$0xf] %v2813_v30  ;;  %v3513_v27 = vunpack.i.h.bf16 %v3509_v33  ;;  %v3510_v35 = vunpack.i.l.bf16 %v3509_v33 }
 0x1fd   : > { %v2846_v18 = vpack.c.bf16 %v3513_v27, %v3513_v27  ;;  %v2814_v36 = vpack.c.bf16 %v3510_v35, %v3510_v35 }
 0x1fe   : > { %v3514_v37 = vpop.trf.xlu0 }
 0x1ff   : > { %1305 = vst [vmem:[#allocation2 + $0x2c] sm:$0xf] %v2846_v18  ;;  %753 = vst [vmem:[#allocation2 + $0x28] sm:$0xf] %v2814_v36  ;;  %v3518_v38 = vunpack.i.h.bf16 %v3514_v37  ;;  %v3515_v39 = vunpack.i.l.bf16 %v3514_v37 }
 0x201   : > { %v2847_v40 = vpack.c.bf16 %v3518_v38, %v3518_v38  ;;  %v2815_v42 = vpack.c.bf16 %v3515_v39, %v3515_v39 }
 0x202   : > { %v3519_v24 = vpop.trf.xlu0 }
 0x203   : > { %1306 = vst [vmem:[#allocation2 + $0x34] sm:$0xf] %v2847_v40  ;;  %754 = vst [vmem:[#allocation2 + $0x30] sm:$0xf] %v2815_v42  ;;  %v3523_v43 = vunpack.i.h.bf16 %v3519_v24  ;;  %v3520_v44 = vunpack.i.l.bf16 %v3519_v24 }
 0x205   : > { %v2848_v21 = vpack.c.bf16 %v3523_v43, %v3523_v43  ;;  %v2816_v45 = vpack.c.bf16 %v3520_v44, %v3520_v44 }
 0x206   : > { %v3524_v46 = vpop.trf.xlu0 }
 0x207   : > { %1307 = vst [vmem:[#allocation2 + $0x3c] sm:$0xf] %v2848_v21  ;;  %755 = vst [vmem:[#allocation2 + $0x38] sm:$0xf] %v2816_v45  ;;  %v3528_v47 = vunpack.i.h.bf16 %v3524_v46  ;;  %v3525_v48 = vunpack.i.l.bf16 %v3524_v46 }
 0x209   : > { %v2849_v49 = vpack.c.bf16 %v3528_v47, %v3528_v47  ;;  %v2817_v26 = vpack.c.bf16 %v3525_v48, %v3525_v48 }
 0x20a   : > { %v3529_v50 = vpop.trf.xlu0 }
 0x20b   : > { %1308 = vst [vmem:[#allocation2 + $0x44] sm:$0xf] %v2849_v49  ;;  %756 = vst [vmem:[#allocation2 + $0x40] sm:$0xf] %v2817_v26  ;;  %v3533_v51 = vunpack.i.h.bf16 %v3529_v50  ;;  %v3530_v52 = vunpack.i.l.bf16 %v3529_v50 }
 0x20d   : > { %v2850_v23 = vpack.c.bf16 %v3533_v51, %v3533_v51  ;;  %v2818_v53 = vpack.c.bf16 %v3530_v52, %v3530_v52 }
 0x20e   : > { %v3534_v54 = vpop.trf.xlu0 }
 0x20f   : > { %1309 = vst [vmem:[#allocation2 + $0x4c] sm:$0xf] %v2850_v23  ;;  %757 = vst [vmem:[#allocation2 + $0x48] sm:$0xf] %v2818_v53  ;;  %v3538_v55 = vunpack.i.h.bf16 %v3534_v54  ;;  %v3535_v29 = vunpack.i.l.bf16 %v3534_v54 }
 0x211   : > { %v2851_v56 = vpack.c.bf16 %v3538_v55, %v3538_v55  ;;  %v2819_v57 = vpack.c.bf16 %v3535_v29, %v3535_v29 }
 0x212   : > { %v3539_v58 = vpop.trf.xlu0 }
 0x213   : > { %1310 = vst [vmem:[#allocation2 + $0x54] sm:$0xf] %v2851_v56  ;;  %758 = vst [vmem:[#allocation2 + $0x50] sm:$0xf] %v2819_v57  ;;  %v3543_v59 = vunpack.i.h.bf16 %v3539_v58  ;;  %v3540_v60 = vunpack.i.l.bf16 %v3539_v58 }
 0x215   : > { %v2852_v20 = vpack.c.bf16 %v3543_v59, %v3543_v59  ;;  %v2820_v61 = vpack.c.bf16 %v3540_v60, %v3540_v60 }
 0x216   : > { %v3544_v34 = vpop.trf.xlu0 }
 0x217   : > { %1311 = vst [vmem:[#allocation2 + $0x5c] sm:$0xf] %v2852_v20  ;;  %759 = vst [vmem:[#allocation2 + $0x58] sm:$0xf] %v2820_v61  ;;  %v3548_v62 = vunpack.i.h.bf16 %v3544_v34  ;;  %v3545_v63 = vunpack.i.l.bf16 %v3544_v34 }
 0x219   : > { %v2853_v0 = vpack.c.bf16 %v3548_v62, %v3548_v62  ;;  %v2821_v1 = vpack.c.bf16 %v3545_v63, %v3545_v63 }
 0x21a   : > { %v3549_v2 = vpop.trf.xlu0 }
 0x21b   : > { %1312 = vst [vmem:[#allocation2 + $0x64] sm:$0xf] %v2853_v0  ;;  %760 = vst [vmem:[#allocation2 + $0x60] sm:$0xf] %v2821_v1  ;;  %v3553_v3 = vunpack.i.h.bf16 %v3549_v2  ;;  %v3550_v31 = vunpack.i.l.bf16 %v3549_v2 }
 0x21d   : > { %v2854_v4 = vpack.c.bf16 %v3553_v3, %v3553_v3  ;;  %v2822_v22 = vpack.c.bf16 %v3550_v31, %v3550_v31 }
 0x21e   : > { %v3554_v28 = vpop.trf.xlu0 }
 0x21f   : > { %1313 = vst [vmem:[#allocation2 + $0x6c] sm:$0xf] %v2854_v4  ;;  %761 = vst [vmem:[#allocation2 + $0x68] sm:$0xf] %v2822_v22  ;;  %v3558_v5 = vunpack.i.h.bf16 %v3554_v28  ;;  %v3555_v6 = vunpack.i.l.bf16 %v3554_v28 }
 0x221   : > { %v2855_v7 = vpack.c.bf16 %v3558_v5, %v3558_v5  ;;  %v2823_v8 = vpack.c.bf16 %v3555_v6, %v3555_v6 }
 0x222   : > { %v3559_v9 = vpop.trf.xlu0 }
 0x223   : > { %1314 = vst [vmem:[#allocation2 + $0x74] sm:$0xf] %v2855_v7  ;;  %762 = vst [vmem:[#allocation2 + $0x70] sm:$0xf] %v2823_v8  ;;  %v3563_v32 = vunpack.i.h.bf16 %v3559_v9  ;;  %v3560_v41 = vunpack.i.l.bf16 %v3559_v9 }
 0x225   : > { %v2856_v10 = vpack.c.bf16 %v3563_v32, %v3563_v32  ;;  %v2824_v11 = vpack.c.bf16 %v3560_v41, %v3560_v41 }
 0x227   : > { %1315 = vst [vmem:[#allocation2 + $0x7c] sm:$0xf] %v2856_v10  ;;  %763 = vst [vmem:[#allocation2 + $0x78] sm:$0xf] %v2824_v11 }
 0x228 PF: > { %v3596_v12 = vld [vmem:[#allocation7 + $0xa8] ss:$12 sps:$4 sm:$0xff]   ;;  %v3597_v25 = vld [vmem:[#allocation7 + $0x90] ss:$12 sps:$4 sm:$0xff]   ;;  %v3598_v13 = vld [vmem:[#allocation7 + $0x78] ss:$12 sps:$4 sm:$0xff]  }
 0x229   : > { %3256 = vmatprep.subr.bf16.mxu0 %v3596_v12  ;;  %v3599_v14 = vld [vmem:[#allocation7 + $0x60] ss:$12 sps:$4 sm:$0xff]   ;;  %s2751_s7 = sshll.u32 %s3920_s24, 7  ;;  %v3600_v33 = vld [vmem:[#allocation7 + $0x48] ss:$12 sps:$4 sm:$0xff]   ;;  %v3947_v1 = vmov 0  }
 0x22a   : > { %3257 = vmatpush3.bf16.msra.mxu0 %v3596_v12  ;;  %s4332_s1 = scalar_lea.vmem %s4140_s13, %s2751_s7 [#allocation4]  ;;  %v3601_v27 = vld [vmem:[#allocation7 + $0x30] ss:$12 sps:$4 sm:$0xff]   ;;  %v3607_v35 = vld [vmem:[#allocation2 + $0x64] ss:$8 sps:$4 sm:$0xff]   ;;  %v3609_v18 = vld [vmem:[#allocation2 + $0x60] ss:$8 sps:$4 sm:$0xff]   ;;  %1742 = vmatprep.mubr.bf16.mxu1 %v3947_v1 }
 0x22b   : > { %3258 = vmatprep.subr.bf16.mxu0 %v3597_v25  ;;  %v1398_v17 = vld [vmem:[%s4332_s1] sm:$0xff]  ;;  %v1399_v19 = vld [vmem:[%s4332_s1 + $0x8] sm:$0xff]  ;;  %v3610_v36 = vld [vmem:[#allocation2 + $0x54] ss:$8 sps:$4 sm:$0xff]   ;;  %s4651_s14 = sld [smem:[#allocation15_spill]]  ;;  %s2803_s21 = sshll.u32 %s3920_s24, 4 }
 0x22c   : > { %v1414_v30 = vpack.c.bf16 %v1399_v19, %v1398_v17  ;;  %v3612_v37 = vld [vmem:[#allocation2 + $0x50] ss:$8 sps:$4 sm:$0xff]   ;;  %v3613_v39 = vld [vmem:[#allocation2 + $0x44] ss:$8 sps:$4 sm:$0xff]   ;;  %v3615_v40 = vld [vmem:[#allocation2 + $0x40] ss:$8 sps:$4 sm:$0xff]  }
 0x22d   : > { %v3602_v38 = vld [vmem:[#allocation7 + $0x18] ss:$12 sps:$4 sm:$0xff]   ;;  %v3616_v42 = vld [vmem:[#allocation2 + $0x34] ss:$8 sps:$4 sm:$0xff]   ;;  %v3603_v24 = vld [vmem:[#allocation7] ss:$12 sps:$4 sm:$0xff]  }
 0x22e   : > { %3259 = vmatpush3.bf16.msra.mxu0 %v3597_v25  ;;  %v3604_v15 = vld [vmem:[#allocation2 + $0x74] ss:$8 sps:$4 sm:$0xff]   ;;  %v3606_v16 = vld [vmem:[#allocation2 + $0x70] ss:$8 sps:$4 sm:$0xff]   ;;  %3272 = vmatprep.mubr.bf16.mxu0 %v1414_v30  ;;  %v1402_v45 = vld [vmem:[%s4332_s1 + $0x20] sm:$0xff]  ;;  %s4652_s13 = sld [smem:[#allocation17_spill]] }
 0x22f   : > { %3260 = vmatprep.subr.bf16.mxu0 %v3598_v13  ;;  %1710 = vmatprep.subr.bf16.mxu1 %v3604_v15  ;;  %v3618_v43 = vld [vmem:[#allocation2 + $0x30] ss:$8 sps:$4 sm:$0xff]   ;;  %v1403_v46 = vld [vmem:[%s4332_s1 + $0x28] sm:$0xff]  ;;  %v1406_v50 = vld [vmem:[%s4332_s1 + $0x40] sm:$0xff]  ;;  %s2528_s9 = sshll.u32 %s4153_s10, 4  ;;  %s4653_s11 = sld [smem:[#allocation22_spill]]  ;;  %s4547_s9 = int_to_ptr.vmem [resolvable:$true] %s2528_s9 }
 0x230   : > { %1711 = vmatpush1.bf16.msra.mxu1 %v3606_v16  ;;  %v1400_v44 = vld [vmem:[%s4332_s1 + $0x10] sm:$0xff]  ;;  %v1401_v21 = vld [vmem:[%s4332_s1 + $0x18] sm:$0xff]  ;;  %v1416_v48 = vpack.c.bf16 %v1403_v46, %v1402_v45  ;;  %v1407_v51 = vld [vmem:[%s4332_s1 + $0x48] sm:$0xff]  ;;  %s4554_s7 = scalar_lea.sflag [#allocation6], %s283_s25  ;;  %s3812_s3 = scalar_lea.vmem %s4547_s9, 2048 }
 0x231   : > { %1712 = vmatprep.subr.bf16.mxu1 %v3607_v35  ;;  %v1415_v47 = vpack.c.bf16 %v1401_v21, %v1400_v44  ;;  %v1404_v49 = vld [vmem:[%s4332_s1 + $0x30] sm:$0xff]  ;;  %v1405_v26 = vld [vmem:[%s4332_s1 + $0x38] sm:$0xff]  ;;  %v1418_v23 = vpack.c.bf16 %v1407_v51, %v1406_v50  ;;  %v1410_v55 = vld [vmem:[%s4332_s1 + $0x60] sm:$0xff]  ;;  %s2804_s16 = sshll.u32 %s4651_s14, 5  ;;  %p3813_p3 = scmp.ne.s32.totalorder %s4547_s9, %s3812_s3 }
 0x232   : > { %3261 = vmatpush3.bf16.msra.mxu0 %v3598_v13  ;;  %v1417_v52 = vpack.c.bf16 %v1405_v26, %v1404_v49  ;;  %v1408_v53 = vld [vmem:[%s4332_s1 + $0x50] sm:$0xff]  ;;  %v1409_v54 = vld [vmem:[%s4332_s1 + $0x58] sm:$0xff]  ;;  %v1411_v29 = vld [vmem:[%s4332_s1 + $0x68] sm:$0xff]  ;;  %s2525_s17 = sadd.s32 %s2804_s16, %s2803_s21  ;;  %s3948_s30 = smov [#allocation10]  }
 0x233   : > { %3262 = vmatprep.subr.bf16.mxu0 %v3599_v14  ;;  %v1419_v56 = vpack.c.bf16 %v1409_v54, %v1408_v53  ;;  %v1420_v57 = vpack.c.bf16 %v1411_v29, %v1410_v55  ;;  %v1412_v58 = vld [vmem:[%s4332_s1 + $0x70] sm:$0xff]  ;;  %v1413_v59 = vld [vmem:[%s4332_s1 + $0x78] sm:$0xff]  ;;  %v3619_v20 = vld [vmem:[#allocation2 + $0x24] ss:$8 sps:$4 sm:$0xff]   ;;  %s2805_s24 = sshll.u32 %s2525_s17, 7  ;;  %s3816_s15 = sshll.u32 %s3948_s30, 4  ;;  %s3817_s15 = int_to_ptr.vmem [resolvable:$false] %s3816_s15 }
 0x234   : > { %1713 = vmatpush1.bf16.msra.mxu1 %v3609_v18  ;;  %v1421_v60 = vpack.c.bf16 %v1413_v59, %v1412_v58  ;;  %v3621_v61 = vld [vmem:[#allocation2 + $0x20] ss:$8 sps:$4 sm:$0xff]   ;;  %v3622_v34 = vld [vmem:[#allocation2 + $0x14] ss:$8 sps:$4 sm:$0xff]   ;;  %v3624_v62 = vld [vmem:[#allocation2 + $0x10] ss:$8 sps:$4 sm:$0xff]   ;;  %p3819_p4 = scmp.lt.s32.totalorder %s4547_s9, %s3817_s15 }
 0x235   : > { %1714 = vmatprep.subr.bf16.mxu1 %v3610_v36  ;;  %v3625_v63 = vld [vmem:[#allocation2 + $0x4] ss:$8 sps:$4 sm:$0xff]   ;;  %v3627_v0 = vld [vmem:[#allocation2] ss:$8 sps:$4 sm:$0xff]   ;;  %s4545_s29 = scalar_lea.hbm %s4653_s11, %s2805_s24  ;;  %p4654_p10 = scmp.ne.s32.totalorder %s4652_s13, 0 }
 0x236   : > { %3263 = vmatpush3.bf16.msra.mxu0 %v3599_v14  ;;  %v2752_v31 = vld [vmem:[%s4616_s2] ss:$0 sm:$0xff]  ;;  %s3818_s5 = scalar_lea.vmem %s3817_s15, 4096 }
 0x237   : > { %3264 = vmatprep.subr.bf16.mxu0 %v3600_v33  ;;  %p3814_p12 = pnand %p3813_p3, %p4654_p10  ;;  %p3820_p6 = scmp.lt.s32.totalorder %s3818_s5, %s3812_s3 }
 0x238   : > { %1715 = vmatpush1.bf16.msra.mxu1 %v3612_v37 }
 0x239   : > { %1716 = vmatprep.subr.bf16.mxu1 %v3613_v39  ;;  %p3815_p2 = pneg %p3814_p12  ;;  %p3821_p5 = por %p3820_p6, %p3819_p4 }
 0x23a   : > { %3265 = vmatpush3.bf16.msra.mxu0 %v3600_v33 }
 0x23b   : > { %3266 = vmatprep.subr.bf16.mxu0 %v3601_v27  ;;  %p3822_p1 = pnand %p3821_p5, %p3815_p2 }
 0x23c   : > { %1717 = vmatpush1.bf16.msra.mxu1 %v3615_v40 }
 0x23d   : > { %1718 = vmatprep.subr.bf16.mxu1 %v3616_v42 }
 0x23e   : > { %3267 = vmatpush3.bf16.msra.mxu0 %v3601_v27 }
 0x23f   : > { %3268 = vmatprep.subr.bf16.mxu0 %v3602_v38 }
 0x240   : > { %1719 = vmatpush1.bf16.msra.mxu1 %v3618_v43 }
 0x241   : > { %1720 = vmatprep.subr.bf16.mxu1 %v3619_v20  ;;  %v3628_v20 = vld [vmem:[#allocation3 + $0x78] sm:$0xff]  }
 0x242   : > { %3269 = vmatpush3.bf16.msra.mxu0 %v3602_v38 }
 0x243   : > { %3270 = vmatprep.subr.bf16.mxu0 %v3603_v24 }
 0x244   : > { %1721 = vmatpush1.bf16.msra.mxu1 %v3621_v61  ;;  %v3629_v61 = vld [vmem:[#allocation3 + $0x38] sm:$0xff]  }
 0x245   : > { %1722 = vmatprep.subr.bf16.mxu1 %v3622_v34  ;;  %v3630_v34 = vld [vmem:[#allocation3 + $0x70] sm:$0xff]  }
 0x246   : > { %3271 = vmatpush3.bf16.msra.mxu0 %v3603_v24 }
 0x247   : > { %3048 = vmatprep.subr.bf16.mxu0 %v3628_v20 }
 0x248   : > { %1723 = vmatpush1.bf16.msra.mxu1 %v3624_v62  ;;  %v3631_v62 = vld [vmem:[#allocation3 + $0x30] sm:$0xff]  }
 0x249   : > { %3273 = vmatmul.mubr.bf16.vlgmr.msra.gmra.mxu0 %v1415_v47  ;;  %1724 = vmatprep.subr.bf16.mxu1 %v3625_v63 }
 0x24a   : > { %3276 = vmatprep.mubr.bf16.mxu0 %v1416_v48  ;;  %3049 = vmatpush3.bf16.msra.mxu0 %v3629_v61 }
 0x24b   : > { %3050 = vmatprep.subr.bf16.mxu0 %v3630_v34 }
 0x24c   : > { %1725 = vmatpush1.bf16.msra.mxu1 %v3627_v0 }
 0x24e   : > { %3051 = vmatpush3.bf16.msra.mxu0 %v3631_v62 }
 0x251   : > { %3277 = vmatmul.mubr.bf16.gmra.mxu0 %v1417_v52 }
 0x252   : > { %3280 = vmatprep.mubr.bf16.mxu0 %v1418_v23 }
 0x259   : > { %3281 = vmatmul.mubr.bf16.gmra.mxu0 %v1419_v56 }
 0x25a   : > { %3284 = vmatprep.mubr.bf16.mxu0 %v1420_v57 }
 0x261   : > { %3285 = vmatmul.mubr.bf16.gmra.mxu0 %v1421_v60 }
 0x309   : > { %v3274_v2 = vpop.f32.mrf.mxu0 }
 0x30a   : > { %v1536_v11 = vadd.f32 %v3274_v2, %v2752_v31 }
 0x30b   : > { %v1527_v3 = vpop.f32.mrf.mxu0 }
 0x30c   : > { %v1528_v22 = vadd.f32 %v2752_v31, %v1527_v3  ;;  %v1592_v13 = vmul.f32 0.088388346, %v1536_v11 }
 0x30d   : > { %v3275_v4 = vpop.f32.mrf.mxu0 }
 0x30e   : > { %v1590_v7 = vmul.f32 0.088388346, %v1528_v22  ;;  %v1539_v32 = vadd.f32 %v3275_v4, %v2752_v31 }
 0x30f   : > { %v1530_v28 = vpop.f32.mrf.mxu0 }
 0x310   : > { %v1531_v5 = vadd.f32 %v2752_v31, %v1530_v28  ;;  %v1593_v12 = vmul.f32 0.088388346, %v1539_v32 }
 0x311   : > { %v3278_v6 = vpop.f32.mrf.mxu0 }
 0x312   : > { %v1591_v8 = vmul.f32 0.088388346, %v1531_v5  ;;  %v1607_v14 = vpack.c.bf16 %v1593_v12, %v1592_v13  ;;  %v1552_v27 = vadd.f32 %v3278_v6, %v2752_v31  ;;  %v3634_v12 = vld [vmem:[#allocation3 + $0x60] sm:$0xff]  }
 0x313   : > { %v1543_v9 = vpop.f32.mrf.mxu0 }
 0x314   : > { %v1606_v41 = vpack.c.bf16 %v1591_v8, %v1590_v7  ;;  %v1544_v15 = vadd.f32 %v2752_v31, %v1543_v9  ;;  %v1596_v37 = vmul.f32 0.088388346, %v1552_v27  ;;  %v3632_v8 = vld [vmem:[#allocation3 + $0x68] sm:$0xff]   ;;  %v3638_v27 = vld [vmem:[#allocation3 + $0x50] sm:$0xff]  }
 0x315   : > { %v3279_v10 = vpop.f32.mrf.mxu0  ;;  %v3633_v9 = vld [vmem:[#allocation3 + $0x28] sm:$0xff]   ;;  %3052 = vmatprep.subr.bf16.mxu0 %v3632_v8 }
 0x316   : > { %1743 = vmatmul.mubr.bf16.vlgmr.msra.gmra.mxu1 %v1606_v41  ;;  %v1594_v19 = vmul.f32 0.088388346, %v1544_v15  ;;  %v1555_v35 = vadd.f32 %v3279_v10, %v2752_v31  ;;  %3053 = vmatpush3.bf16.msra.mxu0 %v3633_v9 }
 0x317   : > { %1752 = vmatprep.mubr.bf16.mxu1 %v3947_v1  ;;  %v1546_v25 = vpop.f32.mrf.mxu0  ;;  %3054 = vmatprep.subr.bf16.mxu0 %v3634_v12 }
 0x318   : > { %v1547_v16 = vadd.f32 %v2752_v31, %v1546_v25  ;;  %v1597_v38 = vmul.f32 0.088388346, %v1555_v35  ;;  %v3635_v25 = vld [vmem:[#allocation3 + $0x20] sm:$0xff]   ;;  %v3639_v35 = vld [vmem:[#allocation3 + $0x10] sm:$0xff]  }
 0x319   : > { %v3282_v17 = vpop.f32.mrf.mxu0 }
 0x31a   : > { %v1595_v30 = vmul.f32 0.088388346, %v1547_v16  ;;  %v1609_v40 = vpack.c.bf16 %v1597_v38, %v1596_v37  ;;  %v1568_v46 = vadd.f32 %v3282_v17, %v2752_v31  ;;  %3055 = vmatpush3.bf16.msra.mxu0 %v3635_v25  ;;  %v3636_v16 = vld [vmem:[#allocation3 + $0x58] sm:$0xff]   ;;  %v3640_v38 = vld [vmem:[#allocation3 + $0x48] sm:$0xff]  }
 0x31b   : > { %v1559_v33 = vpop.f32.mrf.mxu0  ;;  %v3637_v17 = vld [vmem:[#allocation3 + $0x18] sm:$0xff]   ;;  %3056 = vmatprep.subr.bf16.mxu0 %v3636_v16 }
 0x31c   : > { %v1608_v18 = vpack.c.bf16 %v1595_v30, %v1594_v19  ;;  %v1560_v42 = vadd.f32 %v2752_v31, %v1559_v33  ;;  %v1600_v26 = vmul.f32 0.088388346, %v1568_v46 }
 0x31d   : > { %v3283_v36 = vpop.f32.mrf.mxu0 }
 0x31e   : > { %1753 = vmatmul.mubr.bf16.gmra.mxu1 %v1607_v14  ;;  %v1598_v44 = vmul.f32 0.088388346, %v1560_v42  ;;  %v1571_v47 = vadd.f32 %v3283_v36, %v2752_v31  ;;  %3057 = vmatpush3.bf16.msra.mxu0 %v3637_v17 }
 0x31f   : > { %1762 = vmatprep.mubr.bf16.mxu1 %v3947_v1  ;;  %v1562_v39 = vpop.f32.mrf.mxu0  ;;  %3058 = vmatprep.subr.bf16.mxu0 %v3638_v27 }
 0x320   : > { %v1563_v24 = vadd.f32 %v2752_v31, %v1562_v39  ;;  %v1601_v50 = vmul.f32 0.088388346, %v1571_v47  ;;  %v3641_v39 = vld [vmem:[#allocation3 + $0x8] sm:$0xff]  }
 0x321   : > { %v3286_v43 = vpop.f32.mrf.mxu0 }
 0x322   : > { %v1599_v21 = vmul.f32 0.088388346, %v1563_v24  ;;  %v1611_v52 = vpack.c.bf16 %v1601_v50, %v1600_v26  ;;  %v1584_v29 = vadd.f32 %v3286_v43, %v2752_v31  ;;  %3059 = vmatpush3.bf16.msra.mxu0 %v3639_v35  ;;  %v3642_v43 = vld [vmem:[#allocation3 + $0x40] sm:$0xff]  }
 0x323   : > { %v1575_v45 = vpop.f32.mrf.mxu0  ;;  %3060 = vmatprep.subr.bf16.mxu0 %v3640_v38 }
 0x324   : > { %v1610_v48 = vpack.c.bf16 %v1599_v21, %v1598_v44  ;;  %v1576_v23 = vadd.f32 %v2752_v31, %v1575_v45  ;;  %v1604_v58 = vmul.f32 0.088388346, %v1584_v29  ;;  %v3643_v44 = vld [vmem:[#allocation3] sm:$0xff]  }
 0x325   : > { %v3287_v49 = vpop.f32.mrf.mxu0 }
 0x326   : > { %1763 = vmatmul.mubr.bf16.gmra.mxu1 %v1608_v18  ;;  %v1602_v54 = vmul.f32 0.088388346, %v1576_v23  ;;  %v1587_v56 = vadd.f32 %v3287_v49, %v2752_v31  ;;  %3061 = vmatpush3.bf16.msra.mxu0 %v3641_v39 }
 0x327   : > { %1772 = vmatprep.mubr.bf16.mxu1 %v3947_v1  ;;  %v1578_v51 = vpop.f32.mrf.mxu0  ;;  %3062 = vmatprep.subr.bf16.mxu0 %v3642_v43 }
 0x328   : > { %v1579_v53 = vadd.f32 %v2752_v31, %v1578_v51  ;;  %v1605_v59 = vmul.f32 0.088388346, %v1587_v56 }
 0x32a   : > { %v1603_v55 = vmul.f32 0.088388346, %v1579_v53  ;;  %v1613_v60 = vpack.c.bf16 %v1605_v59, %v1604_v58  ;;  %3063 = vmatpush3.bf16.msra.mxu0 %v3643_v44 }
 0x32c   : > { %v1612_v57 = vpack.c.bf16 %v1603_v55, %v1602_v54 }
 0x32e   : > { %1773 = vmatmul.mubr.bf16.gmra.mxu1 %v1609_v40 }
 0x32f   : > { %1782 = vmatprep.mubr.bf16.mxu1 %v3947_v1 }
 0x336   : > { %1783 = vmatmul.mubr.bf16.gmra.mxu1 %v1610_v48 }
 0x337   : > { %1792 = vmatprep.mubr.bf16.mxu1 %v3947_v1 }
 0x33e   : > { %1793 = vmatmul.mubr.bf16.gmra.mxu1 %v1611_v52 }
 0x33f   : > { %1802 = vmatprep.mubr.bf16.mxu1 %v3947_v1 }
 0x346   : > { %1803 = vmatmul.mubr.bf16.gmra.mxu1 %v1612_v57 }
 0x347   : > { %1812 = vmatprep.mubr.bf16.mxu1 %v3947_v1 }
 0x34e   : > { %1813 = vmatmul.mubr.bf16.gmra.mxu1 %v1613_v60 }
 0x3d6   : > { %v4361_v63 = vpop.f32.mrf.mxu1 }
 0x3d8   : > { %v4363_v0 = vpop.f32.mrf.mxu1 }
 0x3d9   : > { %v1823_v2 = vmax.f32 %v4361_v63, %v4363_v0 }
 0x3da   : > { %v4367_v1 = vpop.f32.mrf.mxu1 }
 0x3db   : > { %1824 = vmax.xlane.f32.xlu0 %v1823_v2 }
 0x3dc   : > { %v4369_v3 = vpop.f32.mrf.mxu1 }
 0x3dd   : > { %v1826_v31 = vmax.f32 %v4367_v1, %v4369_v3 }
 0x3de   : > { %v4373_v4 = vpop.f32.mrf.mxu1 }
 0x3df   : > { %1827 = vmax.xlane.f32.xlu0 %v1826_v31 }
 0x3e0   : > { %v4375_v22 = vpop.f32.mrf.mxu1 }
 0x3e1   : > { %v1829_v28 = vmax.f32 %v4373_v4, %v4375_v22 }
 0x3e2   : > { %v4379_v5 = vpop.f32.mrf.mxu1 }
 0x3e3   : > { %1830 = vmax.xlane.f32.xlu1 %v1829_v28 }
 0x3e4   : > { %v4381_v6 = vpop.f32.mrf.mxu1 }
 0x3e5   : > { %v1832_v7 = vmax.f32 %v4379_v5, %v4381_v6 }
 0x3e6   : > { %v4385_v32 = vpop.f32.mrf.mxu1 }
 0x3e7   : > { %1833 = vmax.xlane.f32.xlu1 %v1832_v7 }
 0x3e8   : > { %v4387_v41 = vpop.f32.mrf.mxu1 }
 0x3e9   : > { %v1835_v10 = vmax.f32 %v4385_v32, %v4387_v41 }
 0x3ea   : > { %v4391_v11 = vpop.f32.mrf.mxu1 }
 0x3eb   : > { %1836 = vmax.xlane.f32.xlu0 %v1835_v10 }
 0x3ec   : > { %v4393_v13 = vpop.f32.mrf.mxu1 }
 0x3ed   : > { %v1838_v14 = vmax.f32 %v4391_v11, %v4393_v13 }
 0x3ee   : > { %v4397_v15 = vpop.f32.mrf.mxu1 }
 0x3ef   : > { %1839 = vmax.xlane.f32.xlu1 %v1838_v14 }
 0x3f0   : > { %v4399_v19 = vpop.f32.mrf.mxu1 }
 0x3f1   : > { %v1841_v30 = vmax.f32 %v4397_v15, %v4399_v19 }
 0x3f2   : > { %v4403_v33 = vpop.f32.mrf.mxu1 }
 0x3f3   : > { %1842 = vmax.xlane.f32.xlu0 %v1841_v30 }
 0x3f4   : > { %v4405_v18 = vpop.f32.mrf.mxu1 }
 0x3f5   : > { %v1844_v36 = vmax.f32 %v4403_v33, %v4405_v18 }
 0x3f6   : > { %v4409_v37 = vpop.f32.mrf.mxu1 }
 0x3f7   : > { %1845 = vmax.xlane.f32.xlu1 %v1844_v36 }
 0x3f8   : > { %v4411_v40 = vpop.f32.mrf.mxu1 }
 0x3f9   : > { %v1847_v42 = vmax.f32 %v4409_v37, %v4411_v40 }
 0x3fa   : > { %v4415_v24 = vpop.f32.mrf.mxu1 }
 0x3fb   : > { %1848 = vmax.xlane.f32.xlu0 %v1847_v42 }
 0x3fc   : > { %v4417_v21 = vpop.f32.mrf.mxu1 }
 0x3fd   : > { %v1850_v45 = vmax.f32 %v4415_v24, %v4417_v21 }
 0x3fe   : > { %v4421_v46 = vpop.f32.mrf.mxu1 }
 0x3ff   : > { %1851 = vmax.xlane.f32.xlu1 %v1850_v45 }
 0x400   : > { %v4423_v47 = vpop.f32.mrf.mxu1 }
 0x401   : > { %v1853_v48 = vmax.f32 %v4421_v46, %v4423_v47 }
 0x402   : > { %v4427_v49 = vpop.f32.mrf.mxu1 }
 0x403   : > { %1854 = vmax.xlane.f32.xlu0 %v1853_v48 }
 0x404   : > { %v4429_v26 = vpop.f32.mrf.mxu1 }
 0x405   : > { %v1856_v50 = vmax.f32 %v4427_v49, %v4429_v26 }
 0x406   : > { %v4433_v51 = vpop.f32.mrf.mxu1 }
 0x407   : > { %1857 = vmax.xlane.f32.xlu1 %v1856_v50 }
 0x408   : > { %v4435_v52 = vpop.f32.mrf.mxu1 }
 0x409   : > { %v1859_v23 = vmax.f32 %v4433_v51, %v4435_v52 }
 0x40a   : > { %v4439_v53 = vpop.f32.mrf.mxu1 }
 0x40b   : > { %1860 = vmax.xlane.f32.xlu0 %v1859_v23 }
 0x40c   : > { %v4441_v54 = vpop.f32.mrf.mxu1 }
 0x40d   : > { %v1862_v55 = vmax.f32 %v4439_v53, %v4441_v54 }
 0x40e   : > { %v4445_v29 = vpop.f32.mrf.mxu1 }
 0x40f   : > { %1863 = vmax.xlane.f32.xlu1 %v1862_v55 }
 0x410   : > { %v4447_v56 = vpop.f32.mrf.mxu1 }
 0x411   : > { %v1865_v57 = vmax.f32 %v4445_v29, %v4447_v56 }
 0x412   : > { %v4451_v58 = vpop.f32.mrf.mxu1 }
 0x413   : > { %1866 = vmax.xlane.f32.xlu0 %v1865_v57 }
 0x414   : > { %v4453_v59 = vpop.f32.mrf.mxu1 }
 0x415   : > { %v1868_v60 = vmax.f32 %v4451_v58, %v4453_v59 }
 0x417   : > { %1869 = vmax.xlane.f32.xlu1 %v1868_v60 }
 0x464   : > { %v1825_v20 = vpop.xlane.xlu0 %1824 }
 0x465   : > { %v1871_v34 = vsub.f32 %v4361_v63, %v1825_v20  ;;  %v1872_v62 = vsub.f32 %v4363_v0, %v1825_v20 }
 0x468   : > { %v1828_v61 = vpop.xlane.xlu0 %1827 }
 0x469   : > { %v1873_v2 = vsub.f32 %v4367_v1, %v1828_v61  ;;  %v1874_v31 = vsub.f32 %v4369_v3, %v1828_v61 }
 0x46b   : > { %v1903_v28 = vpack.c.bf16 %v1873_v2, %v1871_v34  ;;  %v1904_v7 = vpack.c.bf16 %v1874_v31, %v1872_v62 }
 0x46c   : > { %v1831_v8 = vpop.xlane.xlu1 %1830 }
 0x46d   : > { %v1920_v9 = vmul.bf16 1069105081, %v1903_v28  ;;  %v1923_v10 = vmul.bf16 1069105081, %v1904_v7  ;;  %v1875_v25 = vsub.f32 %v4373_v4, %v1831_v8  ;;  %v1876_v14 = vsub.f32 %v4375_v22, %v1831_v8 }
 0x46f   : > { %3652 = vpow.bf16 %v1920_v9 }
 0x470   : > { %3654 = vpow.bf16 %v1923_v10  ;;  %v1834_v12 = vpop.xlane.xlu1 %1833 }
 0x471   : > { %v1877_v63 = vsub.f32 %v4379_v5, %v1834_v12  ;;  %v1878_v0 = vsub.f32 %v4381_v6, %v1834_v12 }
 0x473   : > { %v1905_v16 = vpack.c.bf16 %v1877_v63, %v1875_v25  ;;  %v1906_v1 = vpack.c.bf16 %v1878_v0, %v1876_v14 }
 0x474   : > { %v1837_v30 = vpop.xlane.xlu0 %1836 }
 0x475   : > { %v1926_v17 = vmul.bf16 1069105081, %v1905_v16  ;;  %v1929_v3 = vmul.bf16 1069105081, %v1906_v1  ;;  %v1879_v35 = vsub.f32 %v4385_v32, %v1837_v30  ;;  %v1880_v36 = vsub.f32 %v4387_v41, %v1837_v30 }
 0x477   : > { %3656 = vpow.bf16 %v1926_v17 }
 0x478   : > { %3658 = vpow.bf16 %v1929_v3  ;;  %v1840_v27 = vpop.xlane.xlu1 %1839 }
 0x479   : > { %v1881_v4 = vsub.f32 %v4391_v11, %v1840_v27  ;;  %v1882_v22 = vsub.f32 %v4393_v13, %v1840_v27 }
 0x47b   : > { %v1907_v38 = vpack.c.bf16 %v1881_v4, %v1879_v35  ;;  %v1908_v5 = vpack.c.bf16 %v1882_v22, %v1880_v36 }
 0x47c   : > { %v1843_v43 = vpop.xlane.xlu0 %1842 }
 0x47d   : > { %v3653_v39 = vpop.eup %3652  ;;  %v1932_v6 = vmul.bf16 1069105081, %v1907_v38  ;;  %v1935_v42 = vmul.bf16 1069105081, %v1908_v5  ;;  %v1883_v32 = vsub.f32 %v4397_v15, %v1843_v43  ;;  %v1884_v41 = vsub.f32 %v4399_v19, %v1843_v43 }
 0x47e   : > { %v3655_v44 = vpop.eup %3654  ;;  %v1967_v45 = vunpack.c.l.bf16 %v3653_v39  ;;  %v1969_v48 = vunpack.c.h.bf16 %v3653_v39 }
 0x47f   : > { %3660 = vpow.bf16 %v1932_v6  ;;  %2207 = vmatprep.mubr.bf16.mxu0 %v3655_v44  ;;  %v1968_v50 = vunpack.c.l.bf16 %v3655_v44  ;;  %v1970_v23 = vunpack.c.h.bf16 %v3655_v44 }
 0x480   : > { %3662 = vpow.bf16 %v1935_v42  ;;  %2208 = vmatmul.mubr.bf16.vlgmr.msra.gmra.mxu0 %v3653_v39  ;;  %v1846_v11 = vpop.xlane.xlu1 %1845 }
 0x481   : > { %v1885_v13 = vsub.f32 %v4403_v33, %v1846_v11  ;;  %v1886_v55 = vsub.f32 %v4405_v18, %v1846_v11  ;;  %v1999_v57 = vadd.f32 %v1968_v50, %v1967_v45  ;;  %v2002_v60 = vadd.f32 %v1970_v23, %v1969_v48 }
 0x483   : > { %v1909_v20 = vpack.c.bf16 %v1885_v13, %v1883_v32  ;;  %v1910_v61 = vpack.c.bf16 %v1886_v55, %v1884_v41  ;;  %2000 = vadd.xlane.f32.xlu0 %v1999_v57  ;;  %2003 = vadd.xlane.f32.xlu1 %v2002_v60 }
 0x484   : > { %v1849_v31 = vpop.xlane.xlu0 %1848 }
 0x485   : > { %v3657_v34 = vpop.eup %3656  ;;  %v1938_v62 = vmul.bf16 1069105081, %v1909_v20  ;;  %v1941_v2 = vmul.bf16 1069105081, %v1910_v61  ;;  %v1887_v33 = vsub.f32 %v4409_v37, %v1849_v31  ;;  %v1888_v18 = vsub.f32 %v4411_v40, %v1849_v31 }
 0x486   : > { %v3659_v28 = vpop.eup %3658  ;;  %v1971_v15 = vunpack.c.l.bf16 %v3657_v34  ;;  %v1973_v7 = vunpack.c.h.bf16 %v3657_v34 }
 0x487   : > { %3664 = vpow.bf16 %v1938_v62  ;;  %2215 = vmatprep.mubr.bf16.mxu0 %v3659_v28  ;;  %v1972_v19 = vunpack.c.l.bf16 %v3659_v28  ;;  %v1974_v8 = vunpack.c.h.bf16 %v3659_v28 }
 0x488   : > { %3666 = vpow.bf16 %v1941_v2  ;;  %2216 = vmatmul.mubr.bf16.gmra.mxu0 %v3657_v34  ;;  %v1852_v9 = vpop.xlane.xlu1 %1851 }
 0x489   : > { %v1889_v10 = vsub.f32 %v4415_v24, %v1852_v9  ;;  %v1890_v12 = vsub.f32 %v4417_v21, %v1852_v9  ;;  %v2005_v25 = vadd.f32 %v1972_v19, %v1971_v15  ;;  %v2008_v14 = vadd.f32 %v1974_v8, %v1973_v7 }
 0x48b   : > { %v1911_v63 = vpack.c.bf16 %v1889_v10, %v1887_v33  ;;  %v1912_v0 = vpack.c.bf16 %v1890_v12, %v1888_v18  ;;  %2006 = vadd.xlane.f32.xlu0 %v2005_v25  ;;  %2009 = vadd.xlane.f32.xlu1 %v2008_v14 }
 0x48c   : > { %v1855_v3 = vpop.xlane.xlu0 %1854 }
 0x48d   : > { %v3661_v16 = vpop.eup %3660  ;;  %v1944_v1 = vmul.bf16 1069105081, %v1911_v63  ;;  %v1947_v17 = vmul.bf16 1069105081, %v1912_v0  ;;  %v1891_v24 = vsub.f32 %v4421_v46, %v1855_v3  ;;  %v1892_v21 = vsub.f32 %v4423_v47, %v1855_v3  ;;  %v3644_v0 = vld [vmem:[#allocation9 + $0x38] sm:$0xff]  }
 0x48e   : > { %v3663_v30 = vpop.eup %3662  ;;  %v1975_v37 = vunpack.c.l.bf16 %v3661_v16  ;;  %v1977_v27 = vunpack.c.h.bf16 %v3661_v16  ;;  %3288 = vmatprep.subr.bf16.mxu1 %v3644_v0 }
 0x48f   : > { %3668 = vpow.bf16 %v1944_v1  ;;  %2223 = vmatprep.mubr.bf16.mxu0 %v3663_v30  ;;  %v1976_v40 = vunpack.c.l.bf16 %v3663_v30  ;;  %v1978_v35 = vunpack.c.h.bf16 %v3663_v30  ;;  %3289 = vmatpush3.bf16.msra.mxu1 %v3644_v0 }
 0x490   : > { %3670 = vpow.bf16 %v1947_v17  ;;  %2224 = vmatmul.mubr.bf16.gmra.mxu0 %v3661_v16  ;;  %v1858_v36 = vpop.xlane.xlu1 %1857 }
 0x491   : > { %v1893_v4 = vsub.f32 %v4427_v49, %v1858_v36  ;;  %v1894_v22 = vsub.f32 %v4429_v26, %v1858_v36  ;;  %v2011_v38 = vadd.f32 %v1976_v40, %v1975_v37  ;;  %v2014_v5 = vadd.f32 %v1978_v35, %v1977_v27  ;;  %v3645_v37 = vld [vmem:[#allocation9 + $0x30] sm:$0xff]  }
 0x492   : > { %3290 = vmatprep.subr.bf16.mxu1 %v3645_v37 }
 0x493   : > { %v1913_v39 = vpack.c.bf16 %v1893_v4, %v1891_v24  ;;  %v1914_v6 = vpack.c.bf16 %v1894_v22, %v1892_v21  ;;  %2012 = vadd.xlane.f32.xlu0 %v2011_v38  ;;  %2015 = vadd.xlane.f32.xlu1 %v2014_v5  ;;  %v3646_v38 = vld [vmem:[#allocation9 + $0x28] sm:$0xff]  }
 0x494   : > { %v1861_v45 = vpop.xlane.xlu0 %1860  ;;  %3291 = vmatpush3.bf16.msra.mxu1 %v3645_v37 }
 0x495   : > { %v3665_v42 = vpop.eup %3664  ;;  %v1950_v43 = vmul.bf16 1069105081, %v1913_v39  ;;  %v1953_v44 = vmul.bf16 1069105081, %v1914_v6  ;;  %v1895_v49 = vsub.f32 %v4433_v51, %v1861_v45  ;;  %v1896_v26 = vsub.f32 %v4435_v52, %v1861_v45  ;;  %3292 = vmatprep.subr.bf16.mxu1 %v3646_v38  ;;  %v3649_v45 = vld [vmem:[#allocation9 + $0x10] sm:$0xff]  }
 0x496   : > { %v3667_v48 = vpop.eup %3666  ;;  %v1979_v46 = vunpack.c.l.bf16 %v3665_v42  ;;  %v1981_v50 = vunpack.c.h.bf16 %v3665_v42 }
 0x497   : > { %3672 = vpow.bf16 %v1950_v43  ;;  %2231 = vmatprep.mubr.bf16.mxu0 %v3667_v48  ;;  %v1980_v47 = vunpack.c.l.bf16 %v3667_v48  ;;  %v1982_v23 = vunpack.c.h.bf16 %v3667_v48  ;;  %v3647_v43 = vld [vmem:[#allocation9 + $0x20] sm:$0xff]   ;;  %v3650_v48 = vld [vmem:[#allocation9 + $0x8] sm:$0xff]  }
 0x498   : > { %3674 = vpow.bf16 %v1953_v44  ;;  %2232 = vmatmul.mubr.bf16.gmra.mxu0 %v3665_v42  ;;  %v1864_v32 = vpop.xlane.xlu1 %1863  ;;  %3293 = vmatpush3.bf16.msra.mxu1 %v3646_v38  ;;  %v3648_v44 = vld [vmem:[#allocation9 + $0x18] sm:$0xff]  }
 0x499   : > { %v1897_v41 = vsub.f32 %v4439_v53, %v1864_v32  ;;  %v1898_v11 = vsub.f32 %v4441_v54, %v1864_v32  ;;  %v2017_v13 = vadd.f32 %v1980_v47, %v1979_v46  ;;  %v2020_v55 = vadd.f32 %v1982_v23, %v1981_v50  ;;  %3294 = vmatprep.subr.bf16.mxu1 %v3647_v43  ;;  %v3651_v46 = vld [vmem:[#allocation9] sm:$0xff]  }
 0x49b   : > { %v1915_v57 = vpack.c.bf16 %v1897_v41, %v1895_v49  ;;  %v1916_v60 = vpack.c.bf16 %v1898_v11, %v1896_v26  ;;  %2018 = vadd.xlane.f32.xlu0 %v2017_v13  ;;  %2021 = vadd.xlane.f32.xlu1 %v2020_v55 }
 0x49c   : > { %v1867_v62 = vpop.xlane.xlu0 %1866  ;;  %3295 = vmatpush3.bf16.msra.mxu1 %v3647_v43 }
 0x49d   : > { %v3669_v20 = vpop.eup %3668  ;;  %v1956_v61 = vmul.bf16 1069105081, %v1915_v57  ;;  %v1959_v34 = vmul.bf16 1069105081, %v1916_v60  ;;  %v1899_v53 = vsub.f32 %v4445_v29, %v1867_v62  ;;  %v1900_v54 = vsub.f32 %v4447_v56, %v1867_v62  ;;  %3296 = vmatprep.subr.bf16.mxu1 %v3648_v44 }
 0x49e   : > { %v3671_v2 = vpop.eup %3670  ;;  %v1983_v51 = vunpack.c.l.bf16 %v3669_v20  ;;  %v1985_v31 = vunpack.c.h.bf16 %v3669_v20 }
 0x49f   : > { %3676 = vpow.bf16 %v1956_v61  ;;  %2239 = vmatprep.mubr.bf16.mxu0 %v3671_v2  ;;  %v1984_v52 = vunpack.c.l.bf16 %v3671_v2  ;;  %v1986_v28 = vunpack.c.h.bf16 %v3671_v2 }
 0x4a0   : > { %3678 = vpow.bf16 %v1959_v34  ;;  %2240 = vmatmul.mubr.bf16.gmra.mxu0 %v3669_v20  ;;  %v1870_v15 = vpop.xlane.xlu1 %1869  ;;  %3297 = vmatpush3.bf16.msra.mxu1 %v3648_v44 }
 0x4a1   : > { %v1901_v7 = vsub.f32 %v4451_v58, %v1870_v15  ;;  %v1902_v19 = vsub.f32 %v4453_v59, %v1870_v15  ;;  %v2023_v8 = vadd.f32 %v1984_v52, %v1983_v51  ;;  %v2026_v33 = vadd.f32 %v1986_v28, %v1985_v31  ;;  %3298 = vmatprep.subr.bf16.mxu1 %v3649_v45 }
 0x4a3   : > { %v1917_v18 = vpack.c.bf16 %v1901_v7, %v1899_v53  ;;  %v1918_v9 = vpack.c.bf16 %v1902_v19, %v1900_v54  ;;  %2024 = vadd.xlane.f32.xlu0 %v2023_v8  ;;  %2027 = vadd.xlane.f32.xlu1 %v2026_v33 }
 0x4a4   : > { %3299 = vmatpush3.bf16.msra.mxu1 %v3649_v45 }
 0x4a5   : > { %v3673_v10 = vpop.eup %3672  ;;  %v1962_v12 = vmul.bf16 1069105081, %v1917_v18  ;;  %v1965_v25 = vmul.bf16 1069105081, %v1918_v9  ;;  %3300 = vmatprep.subr.bf16.mxu1 %v3650_v48 }
 0x4a6   : > { %v3675_v14 = vpop.eup %3674  ;;  %v1987_v63 = vunpack.c.l.bf16 %v3673_v10  ;;  %v1989_v29 = vunpack.c.h.bf16 %v3673_v10 }
 0x4a7   : > { %3680 = vpow.bf16 %v1962_v12  ;;  %2247 = vmatprep.mubr.bf16.mxu0 %v3675_v14  ;;  %v1988_v56 = vunpack.c.l.bf16 %v3675_v14  ;;  %v1990_v16 = vunpack.c.h.bf16 %v3675_v14 }
 0x4a8   : > { %3682 = vpow.bf16 %v1965_v25  ;;  %2248 = vmatmul.mubr.bf16.gmra.mxu0 %v3673_v10  ;;  %3301 = vmatpush3.bf16.msra.mxu1 %v3650_v48 }
 0x4a9   : > { %v2029_v58 = vadd.f32 %v1988_v56, %v1987_v63  ;;  %v2032_v59 = vadd.f32 %v1990_v16, %v1989_v29  ;;  %3302 = vmatprep.subr.bf16.mxu1 %v3651_v46 }
 0x4ab   : > { %2030 = vadd.xlane.f32.xlu0 %v2029_v58  ;;  %2033 = vadd.xlane.f32.xlu1 %v2032_v59 }
 0x4ac   : > { %3303 = vmatpush3.bf16.msra.mxu1 %v3651_v46 }
 0x4ad   : > { %v3677_v1 = vpop.eup %3676 }
 0x4ae   : > { %v3679_v17 = vpop.eup %3678  ;;  %v1991_v3 = vunpack.c.l.bf16 %v3677_v1  ;;  %v1993_v30 = vunpack.c.h.bf16 %v3677_v1 }
 0x4af   : > { %2255 = vmatprep.mubr.bf16.mxu0 %v3679_v17  ;;  %v1992_v27 = vunpack.c.l.bf16 %v3679_v17  ;;  %v1994_v40 = vunpack.c.h.bf16 %v3679_v17 }
 0x4b0   : > { %2256 = vmatmul.mubr.bf16.gmra.mxu0 %v3677_v1 }
 0x4b1   : > { %v2035_v35 = vadd.f32 %v1992_v27, %v1991_v3  ;;  %v2038_v24 = vadd.f32 %v1994_v40, %v1993_v30 }
 0x4b3   : > { %2036 = vadd.xlane.f32.xlu0 %v2035_v35  ;;  %2039 = vadd.xlane.f32.xlu1 %v2038_v24 }
 0x4b5   : > { %v3681_v21 = vpop.eup %3680 }
 0x4b6   : > { %v3683_v36 = vpop.eup %3682  ;;  %v1997_v4 = vunpack.c.h.bf16 %v3681_v21  ;;  %v1995_v22 = vunpack.c.l.bf16 %v3681_v21 }
 0x4b7   : > { %2263 = vmatprep.mubr.bf16.mxu0 %v3683_v36  ;;  %v1998_v5 = vunpack.c.h.bf16 %v3683_v36  ;;  %v1996_v39 = vunpack.c.l.bf16 %v3683_v36 }
 0x4b8   : > { %2264 = vmatmul.mubr.bf16.gmra.mxu0 %v3681_v21 }
 0x4b9   : > { %v2044_v6 = vadd.f32 %v1998_v5, %v1997_v4  ;;  %v2041_v42 = vadd.f32 %v1996_v39, %v1995_v22 }
 0x4bb   : > { %2045 = vadd.xlane.f32.xlu1 %v2044_v6  ;;  %2042 = vadd.xlane.f32.xlu0 %v2041_v42 }
 0x50c   : > { %v2001_v50 = vpop.xlane.xlu0 %2000  ;;  %v2004_v47 = vpop.xlane.xlu1 %2003 }
 0x50d   : > { %3684 = vrcp.f32 %v2001_v50 }
 0x50e   : > { %3686 = vrcp.f32 %v2004_v47 }
 0x514   : > { %v2007_v23 = vpop.xlane.xlu0 %2006  ;;  %v2010_v49 = vpop.xlane.xlu1 %2009 }
 0x515   : > { %3688 = vrcp.f32 %v2007_v23 }
 0x516   : > { %3690 = vrcp.f32 %v2010_v49 }
 0x51a   : > { %v3685_v55 = vpop.eup %3684 }
 0x51b   : > { %v3687_v20 = vpop.eup %3686 }
 0x51c   : > { %v2013_v57 = vpop.xlane.xlu0 %2012  ;;  %v2016_v61 = vpop.xlane.xlu1 %2015 }
 0x51d   : > { %3692 = vrcp.f32 %v2013_v57 }
 0x51e   : > { %3694 = vrcp.f32 %v2016_v61 }
 0x522   : > { %v3689_v54 = vpop.eup %3688 }
 0x523   : > { %v3691_v19 = vpop.eup %3690 }
 0x524   : > { %v2019_v15 = vpop.xlane.xlu0 %2018  ;;  %v2022_v8 = vpop.xlane.xlu1 %2021 }
 0x525   : > { %3696 = vrcp.f32 %v2019_v15 }
 0x526   : > { %3698 = vrcp.f32 %v2022_v8 }
 0x52a   : > { %v3693_v29 = vpop.eup %3692 }
 0x52b   : > { %v3695_v16 = vpop.eup %3694 }
 0x52c   : > { %v2025_v0 = vpop.xlane.xlu0 %2024  ;;  %v2028_v58 = vpop.xlane.xlu1 %2027 }
 0x52d   : > { %3700 = vrcp.f32 %v2025_v0 }
 0x52e   : > { %3702 = vrcp.f32 %v2028_v58 }
 0x532   : > { %v3697_v35 = vpop.eup %3696 }
 0x533   : > { %v3699_v36 = vpop.eup %3698 }
 0x534   : > { %v2031_v24 = vpop.xlane.xlu0 %2030  ;;  %v2034_v4 = vpop.xlane.xlu1 %2033 }
 0x535   : > { %3704 = vrcp.f32 %v2031_v24 }
 0x536   : > { %3706 = vrcp.f32 %v2034_v4  ;;  %v3718_v4 = vld [vmem:[%s4332_s1 + $0x18] sm:$0xff] }
 0x53a   : > { %v3701_v45 = vpop.eup %3700 }
 0x53b   : > { %v3703_v50 = vpop.eup %3702 }
 0x53c   : > { %v2037_v48 = vpop.xlane.xlu0 %2036  ;;  %v2040_v47 = vpop.xlane.xlu1 %2039 }
 0x53d   : > { %3708 = vrcp.f32 %v2037_v48 }
 0x53e   : > { %3710 = vrcp.f32 %v2040_v47 }
 0x540   : > { %v3064_v26 = vpop.f32.mrf.mxu0 }
 0x542   : > { %v3065_v32 = vpop.f32.mrf.mxu0  ;;  %v3705_v57 = vpop.eup %3704 }
 0x543   : > { %v3066_v11 = vadd.f32 %v3065_v32, %v3064_v26  ;;  %v3707_v61 = vpop.eup %3706 }
 0x544   : > { %v3067_v41 = vpop.f32.mrf.mxu0 }
 0x545   : > { %v2288_v62 = vmul.f32 %v3685_v55, %v3066_v11 }
 0x546   : > { %v3068_v13 = vpop.f32.mrf.mxu0 }
 0x547   : > { %v3069_v60 = vadd.f32 %v3068_v13, %v3067_v41 }
 0x548   : > { %v3070_v34 = vpop.f32.mrf.mxu0 }
 0x549   : > { %v2289_v2 = vmul.f32 %v3687_v20, %v3069_v60  ;;  %v2043_v60 = vpop.xlane.xlu0 %2042 }
 0x54a   : > { %v3071_v51 = vpop.f32.mrf.mxu0  ;;  %3712 = vrcp.f32 %v2043_v60  ;;  %v3709_v15 = vpop.eup %3708 }
 0x54b   : > { %v2304_v31 = vpack.c.bf16 %v2289_v2, %v2288_v62  ;;  %v3072_v28 = vadd.f32 %v3071_v51, %v3070_v34  ;;  %v2046_v34 = vpop.xlane.xlu1 %2045 }
 0x54c   : > { %v3073_v52 = vpop.f32.mrf.mxu0  ;;  %3714 = vrcp.f32 %v2046_v34 }
 0x54d   : > { %3304 = vmatprep.mubr.bf16.mxu1 %v2304_v31  ;;  %v2290_v18 = vmul.f32 %v3689_v54, %v3072_v28 }
 0x54e   : > { %v3074_v53 = vpop.f32.mrf.mxu0 }
 0x54f   : > { %v3075_v7 = vadd.f32 %v3074_v53, %v3073_v52 }
 0x550   : > { %v3076_v33 = vpop.f32.mrf.mxu0 }
 0x551   : > { %v2291_v9 = vmul.f32 %v3691_v19, %v3075_v7  ;;  %v3711_v19 = vpop.eup %3710 }
 0x552   : > { %v3077_v10 = vpop.f32.mrf.mxu0 }
 0x553   : > { %v2305_v12 = vpack.c.bf16 %v2291_v9, %v2290_v18  ;;  %v3078_v14 = vadd.f32 %v3077_v10, %v3076_v33 }
 0x554   : > { %v3079_v25 = vpop.f32.mrf.mxu0 }
 0x555   : > { %3305 = vmatmul.mubr.bf16.vlgmr.msra.gmra.mxu1 %v2305_v12  ;;  %v2292_v1 = vmul.f32 %v3693_v29, %v3078_v14 }
 0x556   : > { %v3080_v63 = vpop.f32.mrf.mxu0 }
 0x557   : > { %v3081_v56 = vadd.f32 %v3080_v63, %v3079_v25  ;;  %v3713_v63 = vpop.eup %3712 }
 0x558   : > { %v3082_v59 = vpop.f32.mrf.mxu0 }
 0x559   : > { %v2293_v17 = vmul.f32 %v3695_v16, %v3081_v56  ;;  %v3715_v0 = vpop.eup %3714 }
 0x55a   : > { %v3083_v3 = vpop.f32.mrf.mxu0 }
 0x55b   : > { %v2306_v30 = vpack.c.bf16 %v2293_v17, %v2292_v1  ;;  %v3084_v27 = vadd.f32 %v3083_v3, %v3082_v59  ;;  %v4492_v59 = vld [vmem:[%s4618_s4] ss:$0 sm:$0xff] }
 0x55c   : > { %v3085_v37 = vpop.f32.mrf.mxu0 }
 0x55d   : > { %3308 = vmatprep.mubr.bf16.mxu1 %v2306_v30  ;;  %v2294_v38 = vmul.f32 %v3697_v35, %v3084_v27  ;;  %v3716_v30 = vld [vmem:[%s4332_s1 + $0x10] sm:$0xff]  ;;  %v3717_v35 = vld [vmem:[%s4332_s1] sm:$0xff] }
 0x55e   : > { %v3086_v40 = vpop.f32.mrf.mxu0 }
 0x55f   : > { %v3087_v21 = vadd.f32 %v3086_v40, %v3085_v37 }
 0x560   : > { %v3088_v22 = vpop.f32.mrf.mxu0 }
 0x561   : > { %v2295_v5 = vmul.f32 %v3699_v36, %v3087_v21 }
 0x562   : > { %v3089_v39 = vpop.f32.mrf.mxu0 }
 0x563   : > { %v2307_v6 = vpack.c.bf16 %v2295_v5, %v2294_v38  ;;  %v3090_v43 = vadd.f32 %v3089_v39, %v3088_v22  ;;  %v3719_v5 = vld [vmem:[%s4332_s1 + $0x8] sm:$0xff] }
 0x564   : > { %v3091_v42 = vpop.f32.mrf.mxu0 }
 0x565   : > { %3309 = vmatmul.mubr.bf16.gmra.mxu1 %v2307_v6  ;;  %v2296_v49 = vmul.f32 %v3701_v45, %v3090_v43 }
 0x566   : > { %v3092_v44 = vpop.f32.mrf.mxu0 }
 0x567   : > { %v3093_v46 = vadd.f32 %v3092_v44, %v3091_v42  ;;  %v3720_v44 = vld [vmem:[%s4332_s1 + $0x30] sm:$0xff] }
 0x568   : > { %v3094_v23 = vpop.f32.mrf.mxu0 }
 0x569   : > { %v2297_v26 = vmul.f32 %v3703_v50, %v3093_v46  ;;  %v3721_v50 = vld [vmem:[%s4332_s1 + $0x20] sm:$0xff] }
 0x56a   : > { %v3095_v32 = vpop.f32.mrf.mxu0 }
 0x56b   : > { %v2308_v41 = vpack.c.bf16 %v2297_v26, %v2296_v49  ;;  %v3096_v13 = vadd.f32 %v3095_v32, %v3094_v23  ;;  %v3722_v26 = vld [vmem:[%s4332_s1 + $0x38] sm:$0xff] }
 0x56c   : > { %v3097_v11 = vpop.f32.mrf.mxu0 }
 0x56d   : > { %3312 = vmatprep.mubr.bf16.mxu1 %v2308_v41  ;;  %v2298_v2 = vmul.f32 %v3705_v57, %v3096_v13 }
 0x56e   : > { %v3098_v55 = vpop.f32.mrf.mxu0 }
 0x56f   : > { %v3099_v20 = vadd.f32 %v3098_v55, %v3097_v11  ;;  %v3723_v11 = vld [vmem:[%s4332_s1 + $0x28] sm:$0xff] }
 0x570   : > { %v3100_v62 = vpop.f32.mrf.mxu0 }
 0x571   : > { %v2299_v51 = vmul.f32 %v3707_v61, %v3099_v20  ;;  %v3724_v20 = vld [vmem:[%s4332_s1 + $0x50] sm:$0xff] }
 0x572   : > { %v3101_v31 = vpop.f32.mrf.mxu0 }
 0x573   : > { %v2309_v52 = vpack.c.bf16 %v2299_v51, %v2298_v2  ;;  %v3102_v53 = vadd.f32 %v3101_v31, %v3100_v62  ;;  %v3725_v2 = vld [vmem:[%s4332_s1 + $0x40] sm:$0xff] }
 0x574   : > { %v3103_v28 = vpop.f32.mrf.mxu0 }
 0x575   : > { %3313 = vmatmul.mubr.bf16.gmra.mxu1 %v2309_v52  ;;  %v2300_v33 = vmul.f32 %v3709_v15, %v3102_v53  ;;  %v3727_v15 = vld [vmem:[%s4332_s1 + $0x48] sm:$0xff] }
 0x576   : > { %v3104_v54 = vpop.f32.mrf.mxu0 }
 0x577   : > { %v3105_v7 = vadd.f32 %v3104_v54, %v3103_v28  ;;  %v3726_v28 = vld [vmem:[%s4332_s1 + $0x58] sm:$0xff] }
 0x578   : > { %v3106_v8 = vpop.f32.mrf.mxu0 }
 0x579   : > { %v2301_v18 = vmul.f32 %v3711_v19, %v3105_v7 }
 0x57a   : > { %v3107_v9 = vpop.f32.mrf.mxu0 }
 0x57b   : > { %v2310_v10 = vpack.c.bf16 %v2301_v18, %v2300_v33  ;;  %v3108_v25 = vadd.f32 %v3107_v9, %v3106_v8  ;;  %v3728_v18 = vld [vmem:[%s4332_s1 + $0x70] sm:$0xff] }
 0x57c   : > { %v3109_v12 = vpop.f32.mrf.mxu0 }
 0x57d   : > { %3316 = vmatprep.mubr.bf16.mxu1 %v2310_v10  ;;  %v2302_v56 = vmul.f32 %v3713_v63, %v3108_v25  ;;  %v3729_v25 = vld [vmem:[%s4332_s1 + $0x60] sm:$0xff] }
 0x57e   : > { %v3110_v14 = vpop.f32.mrf.mxu0 }
 0x57f   : > { %v3111_v29 = vadd.f32 %v3110_v14, %v3109_v12 }
 0x581   : > { %v2303_v16 = vmul.f32 %v3715_v0, %v3111_v29  ;;  %v3730_v0 = vld [vmem:[%s4332_s1 + $0x78] sm:$0xff] }
 0x583   : > { %v2311_v58 = vpack.c.bf16 %v2303_v16, %v2302_v56 }
 0x585   : > { %3317 = vmatmul.mubr.bf16.gmra.mxu1 %v2311_v58  ;;  %v3731_v58 = vld [vmem:[%s4332_s1 + $0x68] sm:$0xff] }
 0x615   : > { %v3306_v1 = vpop.f32.mrf.mxu1 }
 0x616   : > { %v2426_v17 = vadd.f32 %v3306_v1, %v4492_v59 }
 0x617   : > { %v2417_v3 = vpop.f32.mrf.mxu1 }
 0x618   : > { %v2482_v37 = vadd.f32 %v3716_v30, %v2426_v17  ;;  %v2418_v27 = vadd.f32 %v4492_v59, %v2417_v3 }
 0x619   : > { %v3307_v40 = vpop.f32.mrf.mxu1 }
 0x61a   : > { %2498 = vst [vmem:[%s4153_s10 + $0x10] sm:$0xff] %v2482_v37  ;;  %v2480_v24 = vadd.f32 %v3717_v35, %v2418_v27  ;;  %v2429_v21 = vadd.f32 %v3307_v40, %v4492_v59 }
 0x61b   : > { %v2420_v36 = vpop.f32.mrf.mxu1 }
 0x61c   : > { %2496 = vst [vmem:[%s4153_s10] sm:$0xff] %v2480_v24  ;;  %v2483_v22 = vadd.f32 %v3718_v4, %v2429_v21  ;;  %v2421_v38 = vadd.f32 %v4492_v59, %v2420_v36 }
 0x61e   : > { %2499 = vst [vmem:[%s4153_s10 + $0x18] sm:$0xff] %v2483_v22  ;;  %v2481_v39 = vadd.f32 %v3719_v5, %v2421_v38 }
 0x620   : > { %2497 = vst [vmem:[%s4153_s10 + $0x8] sm:$0xff] %v2481_v39 }
 0x625   : > { %v3310_v6 = vpop.f32.mrf.mxu1 }
 0x626   : > { %v2442_v42 = vadd.f32 %v3310_v6, %v4492_v59 }
 0x627   : > { %v2433_v43 = vpop.f32.mrf.mxu1 }
 0x628   : > { %v2486_v45 = vadd.f32 %v3720_v44, %v2442_v42  ;;  %v2434_v48 = vadd.f32 %v4492_v59, %v2433_v43 }
 0x629   : > { %v3311_v46 = vpop.f32.mrf.mxu1 }
 0x62a   : > { %2502 = vst [vmem:[%s4153_s10 + $0x30] sm:$0xff] %v2486_v45  ;;  %v2484_v47 = vadd.f32 %v3721_v50, %v2434_v48  ;;  %v2445_v23 = vadd.f32 %v3311_v46, %v4492_v59 }
 0x62b   : > { %v2436_v49 = vpop.f32.mrf.mxu1 }
 0x62c   : > { %2500 = vst [vmem:[%s4153_s10 + $0x20] sm:$0xff] %v2484_v47  ;;  %v2487_v32 = vadd.f32 %v3722_v26, %v2445_v23  ;;  %v2437_v41 = vadd.f32 %v4492_v59, %v2436_v49 }
 0x62e   : > { %2503 = vst [vmem:[%s4153_s10 + $0x38] sm:$0xff] %v2487_v32  ;;  %v2485_v13 = vadd.f32 %v3723_v11, %v2437_v41 }
 0x630   : > { %2501 = vst [vmem:[%s4153_s10 + $0x28] sm:$0xff] %v2485_v13 }
 0x635   : > { %v3314_v55 = vpop.f32.mrf.mxu1 }
 0x636   : > { %v2458_v57 = vadd.f32 %v3314_v55, %v4492_v59 }
 0x637   : > { %v2449_v60 = vpop.f32.mrf.mxu1 }
 0x638   : > { %v2490_v61 = vadd.f32 %v3724_v20, %v2458_v57  ;;  %v2450_v34 = vadd.f32 %v4492_v59, %v2449_v60 }
 0x639   : > { %v3315_v62 = vpop.f32.mrf.mxu1 }
 0x63a   : > { %2506 = vst [vmem:[%s4153_s10 + $0x50] sm:$0xff] %v2490_v61  ;;  %v2488_v51 = vadd.f32 %v3725_v2, %v2450_v34  ;;  %v2461_v31 = vadd.f32 %v3315_v62, %v4492_v59 }
 0x63b   : > { %v2452_v52 = vpop.f32.mrf.mxu1 }
 0x63c   : > { %2504 = vst [vmem:[%s4153_s10 + $0x40] sm:$0xff] %v2488_v51  ;;  %v2491_v53 = vadd.f32 %v3726_v28, %v2461_v31  ;;  %v2453_v54 = vadd.f32 %v4492_v59, %v2452_v52 }
 0x63e   : > { %2507 = vst [vmem:[%s4153_s10 + $0x58] sm:$0xff] %v2491_v53  ;;  %v2489_v7 = vadd.f32 %v3727_v15, %v2453_v54 }
 0x640   : > { %2505 = vst [vmem:[%s4153_s10 + $0x48] sm:$0xff] %v2489_v7 }
 0x645   : > { %v3318_v19 = vpop.f32.mrf.mxu1 }
 0x646   : > { %v2474_v8 = vadd.f32 %v3318_v19, %v4492_v59 }
 0x647   : > { %v2465_v33 = vpop.f32.mrf.mxu1 }
 0x648   : > { %v2494_v9 = vadd.f32 %v3728_v18, %v2474_v8  ;;  %v2466_v10 = vadd.f32 %v4492_v59, %v2465_v33 }
 0x649   : > { %v3319_v12 = vpop.f32.mrf.mxu1 }
 0x64a   : > { %2510 = vst [vmem:[%s4153_s10 + $0x70] sm:$0xff] %v2494_v9  ;;  %v2492_v14 = vadd.f32 %v3729_v25, %v2466_v10  ;;  %v2477_v63 = vadd.f32 %v3319_v12, %v4492_v59 }
 0x64b   : > { %v2468_v29 = vpop.f32.mrf.mxu1 }
 0x64c   : > { %2508 = vst [vmem:[%s4153_s10 + $0x60] sm:$0xff] %v2492_v14  ;;  %v2495_v56 = vadd.f32 %v3730_v0, %v2477_v63  ;;  %v2469_v16 = vadd.f32 %v4492_v59, %v2468_v29 }
 0x64e   : > { %2511 = vst [vmem:[%s4153_s10 + $0x78] sm:$0xff] %v2495_v56  ;;  %v2493_v1 = vadd.f32 %v3731_v58, %v2469_v16 }
 0x650   : > { %2509 = vst [vmem:[%s4153_s10 + $0x68] sm:$0xff] %v2493_v1 }
 0x651   : > { %3825 = shalt.err (!%p3822_p1)
}
 0x652   : > { %s3826_s25 = scalar_lea.hbm %s4545_s29, 2048  ;;  %s3830_s14 = scalar_lea.hbm %s4653_s11, 8192 }
 0x653   : > { %p3827_p7 = scmp.ne.s32.totalorder %s4545_s29, %s3826_s25  ;;  %p3831_p0 = scmp.lt.s32.totalorder %s4545_s29, %s4653_s11 }
 0x654   : > { %p3832_p8 = scmp.lt.s32.totalorder %s3830_s14, %s3826_s25 }
 0x655   : > { %p3828_p9 = pnand %p3827_p7, %p4654_p10 }
 0x656   : > { %p3833_p11 = por %p3832_p8, %p3831_p0 }
 0x657   : > { %p3829_p13 = pneg %p3828_p9 }
 0x659   : > { %p3834_p3 = pnand %p3833_p11, %p3829_p13 }
 0x65b   : > { %3837 = shalt.err (!%p3834_p3)
}
 0x65c   : > { %s3949_s17 = smov 128   ;;  %s3950_s24 = smov 8  }
 0x65d   : > { %3330 = dma.vmem_to_hbm [thread:$0]  (%p4654_p10), %s4547_s9, 2048, %s4545_s29, %s4554_s7, %s3949_s17, %s3949_s17, %s3950_s24  }
 0x65e PF: > { %s4655_s6 = sld [smem:[#allocation14_spill]]  ;;  %p3352_p12 = scmp.ge.s32.totalorder %s3936_s28, 2 }
 0x65f   : > { %s4656_s8 = sld [smem:[#allocation18_spill]] }
 0x664   : > { %s2543_s3 = sand.u32 1, %s4655_s6  }
 0x665   : > { %p4657_p2 = scmp.ne.s32.totalorder %s4656_s8, 0  ;;  %s2544_s30 = scalar_lea.sflag [#allocation6], %s2543_s3 }
 0x667   : > { %p3344_p4 = pnand %p3352_p12, %p4657_p2 }
 0x669   : > { %p3345_p6 = pneg %p3344_p4 }
 0x66b   : > { %3891 = dma.done.wait (%p3345_p6), %s2544_s30, 2048  }
 0x66c   : > { %3893 = vsyncadd (%p3345_p6), %s2544_s30, 4294965248  ;;  %s22_s28 = sadd.s32 1, %s3936_s28   ;;  %s4658_s13 = smov %s4118_s18 }
 0x66d   : > { %p19_p5 = scmp.ge.s32.totalorder %s22_s28, 6   ;;  %s4659_s24 = sld [smem:[#allocation16_spill]] }
 0x66e   : > { %s4660_s9 = sld [smem:[#allocation19_spill]]  ;;  %s4661_s18 = smov %s3900_s19 }
 0x66f   : > { %s4662_s19 = smov %s3904_s20  ;;  %s4663_s20 = smov %s4123_s26 }
 0x670   : > { %s4664_s21 = smov %s3912_s22  ;;  %s4665_s22 = smov %s3916_s23 }
 0x671   : > { %s4666_s23 = smov %s4658_s13  ;;  %s4667_s25 = smov %s3932_s27 }
 0x672   : > { %s4669_s27 = smov %s4675_s12  ;;  %21 = sbr.rel (!%p19_p5) target bundleno = 14 (0xe), region = 98 }
 0x674   : > { %s4668_s26 = smov %s4660_s9 }
 0x677   :  { %2549 = vsyncpa [#allocation5], 1 }
 0x678   :  { %2551 = vsyncpa [#allocation5 + $0x1], 1 }
 0x679   :  { %2552 = vsyncpa [#allocation8], 1 }
 0x67a   :  { %2553 = vsyncpa [#allocation6], 1 }
 0x67b   :  { %2555 = vsyncpa [#allocation6 + $0x1], 1 }

</bundles_post_ra>
